<compile_context>
chip_gen: v5e
topology: v5e:2x2
jax: 0.10.0
libtpu: 0.0.40
codegen_flags: <defaults>
</compile_context>

<pallas_src>
import math

import jax
import jax.numpy as jnp
import numpy as np
from jax import lax
from jax.experimental import pallas as pl
from jax.experimental.pallas import tpu as pltpu


def _layernorm(x, gamma, beta, eps=1e-5):
    """LayerNorm over the last axis (f32 math), PyTorch nn.LayerNorm semantics."""
    mu = jnp.mean(x, axis=-1, keepdims=True)
    xc = x - mu
    var = jnp.mean(xc * xc, axis=-1, keepdims=True)
    return xc * lax.rsqrt(var + eps) * gamma + beta


# -----------------------------------------------------------------------------
# Fused kernel: one group of P (batch, variable) pairs = an (M, D) row slab per grid step.
# -----------------------------------------------------------------------------
def _encoder_layer_kernel(x_ref, bias_ref,
                          g1_ref, be1_ref, w1_ref, b1_ref,
                          w2_ref, b2_ref, g2_ref, be2_ref,
                          z_ref, attn_ref):
    # x_ref:   (M, D) f32      bias_ref: (M, M) f32 additive mask (0 allowed / -1e30 masked)
    # w1_ref:  (D, E) bf16     b1_ref:   (1, E) f32
    # w2_ref:  (E, D) bf16     b2_ref:   (1, D) f32
    # z_ref:   (M, D) f32      attn_ref: (M, M) bf16 (block-diagonal attention slab)
    x = x_ref[...]                                   # f32
    xb = x.astype(jnp.bfloat16)                      # MXU operand
    scale = 1.0 / math.sqrt(x.shape[-1])

    # ---- label + block-diagonal masked scaled-dot-product self-attention (stand-in) ----
    s = lax.dot_general(xb, xb, (((1,), (1,)), ((), ())),
                        preferred_element_type=jnp.float32)     # (M, M) = Q @ K^T
    s = s * scale + bias_ref[...]

    m = jnp.max(s, axis=-1, keepdims=True)
    e = jnp.exp(s - m)
    denom = jnp.sum(e, axis=-1, keepdims=True)
    p = e * pl.reciprocal(denom, approx=True)        # softmax; reciprocal on EUP slot
    p_bf = p.astype(jnp.bfloat16)
    attn_ref[...] = p_bf                             # lane-dense bf16 store (last dim = M)

    new_x = jnp.dot(p_bf, xb, preferred_element_type=jnp.float32)   # (M, D) f32

    # ---- residual + LayerNorm1 (f32; dropout == identity in eval) ----
    xn = _layernorm(x + new_x, g1_ref[...], be1_ref[...])

    # ---- 1x1 convs == position-wise MLP D -> E -> D with ReLU (bf16 MXU, f32 accumulate) ----
    y = jnp.dot(xn.astype(jnp.bfloat16), w1_ref[...],
                preferred_element_type=jnp.float32) + b1_ref[...]
    y = jnp.maximum(y, 0.0)
    y = jnp.dot(y.astype(jnp.bfloat16), w2_ref[...],
                preferred_element_type=jnp.float32) + b2_ref[...]

    # ---- residual (post-norm1 tensor, as in the PyTorch module) + LayerNorm2 ----
    z = _layernorm(xn + y, g2_ref[...], be2_ref[...])
    z_ref[...] = z.astype(z_ref.dtype)


# -----------------------------------------------------------------------------
# Tiling heuristic: pick pairs-per-group P so the fused tile has M = P*L rows.
# Prefers M >= 128 (MXU rows filled); keeps >= 2 grid steps (v7x megacore) when compatible.
# -----------------------------------------------------------------------------
def _choose_pairs_per_group(total_pairs, seq_len, row_target=128, row_cap=512):
    best = None
    for p in range(1, total_pairs + 1):
        if total_pairs % p:
            continue
        groups = total_pairs // p
        rows = p * seq_len
        if best is not None and rows > row_cap:
            break
        if groups > 1 and rows % 16 != 0:     # non-full blocks must respect sublane tiling
            continue
        best = p
        if rows >= row_target and groups >= 2:
            break
    return best if best is not None else total_pairs


# -----------------------------------------------------------------------------
# Wrapper
# -----------------------------------------------------------------------------
def encoder_layer_forward(x, label_arr, params):
    """x: (B, L, V, D) float32, label_arr: (B, L) int. Returns (z, attention)."""
    B, L, V, D = x.shape
    E = params["w1"].shape[1]

    total_pairs = B * V
    P = _choose_pairs_per_group(total_pairs, L)
    G = total_pairs // P
    M = P * L

    # One-time contiguous relayout: (B, L, V, D) -> (B, V, L, D) -> (B*V*L, D).
    x_flat = jnp.transpose(x, (0, 2, 1, 3)).reshape(total_pairs * L, D)

    # Additive attention-mask bias: a position may attend iff same (b, v) pair AND same label.
    lab = jnp.broadcast_to(label_arr.astype(jnp.int32)[:, None, :], (B, V, L))
    lab_groups = lab.reshape(G, M)                                       # per-group flat labels
    pair_ids = jnp.repeat(jnp.arange(P, dtype=jnp.int32), L)             # local pair id per row
    same_pair = pair_ids[:, None] == pair_ids[None, :]                   # (M, M)
    same_label = lab_groups[:, :, None] == lab_groups[:, None, :]        # (G, M, M)
    bias = jnp.where(same_pair[None] & same_label, 0.0, -1e30).astype(jnp.float32)
    bias_flat = bias.reshape(G * M, M)

    w1 = params["w1"].astype(jnp.bfloat16)        # MXU-native weights (halve weight DMA traffic)
    w2 = params["w2"].astype(jnp.bfloat16)

    const = lambda shape: pl.BlockSpec(shape, lambda g: (0, 0))
    row_tile = lambda cols: pl.BlockSpec((M, cols), lambda g: (g, 0))

    z_flat, attn_flat = pl.pallas_call(
        _encoder_layer_kernel,
        out_shape=(
            jax.ShapeDtypeStruct((total_pairs * L, D), x.dtype),
            jax.ShapeDtypeStruct((G * M, M), jnp.bfloat16),
        ),
        grid_spec=pltpu.PrefetchScalarGridSpec(
            num_scalar_prefetch=0,
            grid=(G,),
            in_specs=[
                row_tile(D),                       # x slab (M, D), contiguous
                row_tile(M),                       # additive mask bias slab (M, M)
                const((1, D)), const((1, D)),      # gamma1, beta1
                const((D, E)), const((1, E)),      # conv1 weight (bf16), bias
                const((E, D)), const((1, D)),      # conv2 weight (bf16), bias
                const((1, D)), const((1, D)),      # gamma2, beta2
            ],
            out_specs=[
                row_tile(D),                       # z slab (M, D)
                row_tile(M),                       # attention slab (M, M), bf16 lane-dense
            ],
        ),
        compiler_params=pltpu.CompilerParams(
            dimension_semantics=("parallel",),
        ),
    )(x_flat, bias_flat,
      params["gamma1"], params["beta1"], w1, params["b1"],
      w2, params["b2"], params["gamma2"], params["beta2"])

    # (B*V*L, D) -> (B, V, L, D) -> (B, L, V, D)
    z = jnp.transpose(z_flat.reshape(B, V, L, D), (0, 2, 1, 3))

    # Extract per-pair (L, L) diagonal blocks of the block-diagonal attention slab.
    attn_blocks = attn_flat.reshape(G, P, L, P, L)
    attn_diag = jnp.diagonal(attn_blocks, axis1=1, axis2=3)      # (G, L, L, P)
    attn = jnp.transpose(attn_diag, (0, 3, 1, 2)).reshape(B, V, L, L).astype(jnp.float32)
    return z, attn


# -----------------------------------------------------------------------------
# Pure-JAX reference mirroring the kernel math (same bf16 casts at the matmuls),
# computed per (b, v) pair to independently validate the block-diagonal slab path.
# -----------------------------------------------------------------------------
def _reference_forward(x, label_arr, params):
    B, L, V, D = x.shape
    xb = x.astype(jnp.bfloat16)
    scale = 1.0 / math.sqrt(D)
    s = jnp.einsum('blvd,bkvd->bvlk', xb, xb, preferred_element_type=jnp.float32) * scale
    mask = label_arr[:, None, :, None] == label_arr[:, None, None, :]     # (B,1,L,L)
    s = jnp.where(mask, s, -1e30)
    p = jax.nn.softmax(s, axis=-1)                                        # (B,V,L,L)
    new_x = jnp.einsum('bvlk,bkvd->blvd', p.astype(jnp.bfloat16), xb,
                       preferred_element_type=jnp.float32)
    xn = _layernorm(x + new_x, params["gamma1"], params["beta1"])
    w1 = params["w1"].astype(jnp.bfloat16)
    w2 = params["w2"].astype(jnp.bfloat16)
    y = jnp.einsum('blvd,de->blve', xn.astype(jnp.bfloat16), w1,
                   preferred_element_type=jnp.float32) + params["b1"][0]
    y = jnp.maximum(y, 0.0)
    y = jnp.einsum('blve,ed->blvd', y.astype(jnp.bfloat16), w2,
                   preferred_element_type=jnp.float32) + params["b2"][0]
    z = _layernorm(xn + y, params["gamma2"], params["beta2"])
    return z, p


def init_params(key, d_model, d_exp):
    k1, k2, k3, k4 = jax.random.split(key, 4)
    s1 = 1.0 / jnp.sqrt(jnp.float32(d_model))
    s2 = 1.0 / jnp.sqrt(jnp.float32(d_exp))
    return {
        "gamma1": jnp.ones((1, d_model), jnp.float32),
        "beta1": jnp.zeros((1, d_model), jnp.float32),
        "gamma2": jnp.ones((1, d_model), jnp.float32),
        "beta2": jnp.zeros((1, d_model), jnp.float32),
        # conv1: Conv2d(d_model, d_exp, 1)  <->  matmul weight (d_model, d_exp)
        "w1": jax.random.normal(k1, (d_model, d_exp), jnp.float32) * s1,
        "b1": jax.random.normal(k2, (1, d_exp), jnp.float32) * s1,
        # conv2: Conv2d(d_exp, d_model, 1)  <->  matmul weight (d_exp, d_model)
        "w2": jax.random.normal(k3, (d_exp, d_model), jnp.float32) * s2,
        "b2": jax.random.normal(k4, (1, d_model), jnp.float32) * s2,
    }


if __name__ == "__main__":
    B, L, V, D = 2, 16, 4, 128     # lane-dense d_model; d_exp = 2 * d_model (module default)
    E = 2 * D

    key = jax.random.PRNGKey(0)
    kx, kl, kp = jax.random.split(key, 3)

    x = jax.random.normal(kx, (B, L, V, D), jnp.float32)
    label_arr = jax.random.randint(kl, (B, L), 0, 3, jnp.int32)
    params = init_params(kp, D, E)

    z, attention = encoder_layer_forward(x, label_arr, params)
    jax.block_until_ready((z, attention))

    assert z.shape == (B, L, V, D) and z.dtype == x.dtype
    assert attention.shape == (B, V, L, L)

    z_ref, p_ref = _reference_forward(x, label_arr, params)
    np.testing.assert_allclose(np.asarray(z), np.asarray(z_ref), atol=5e-2, rtol=5e-2)
    np.testing.assert_allclose(np.asarray(attention), np.asarray(p_ref), atol=5e-2, rtol=5e-2)

    print("KERNEL_OK")
</pallas_src>

<mosaic_0001>
module attributes {stable_mosaic.version = 11 : i64} {
  func.func @_encoder_layer_kernel(%arg0: i32, %arg1: memref<128x128xf32, #tpu.memory_space<vmem>>, %arg2: memref<128x128xf32, #tpu.memory_space<vmem>>, %arg3: memref<1x128xf32, #tpu.memory_space<vmem>>, %arg4: memref<1x128xf32, #tpu.memory_space<vmem>>, %arg5: memref<128x256xbf16, #tpu.memory_space<vmem>>, %arg6: memref<1x256xf32, #tpu.memory_space<vmem>>, %arg7: memref<256x128xbf16, #tpu.memory_space<vmem>>, %arg8: memref<1x128xf32, #tpu.memory_space<vmem>>, %arg9: memref<1x128xf32, #tpu.memory_space<vmem>>, %arg10: memref<1x128xf32, #tpu.memory_space<vmem>>, %arg11: memref<128x128xf32, #tpu.memory_space<vmem>>, %arg12: memref<128x128xbf16, #tpu.memory_space<vmem>>) attributes {dimension_semantics = [#tpu.dimension_semantics<parallel>], iteration_bounds = array<i64: 1>, scalar_prefetch = 0 : i64, scratch_operands = 0 : i64, tpu.core_type = #tpu.core_type<tc>, window_params = [{transform_indices = @transform_0, window_bounds = array<i64: 128, 128>}, {transform_indices = @transform_1, window_bounds = array<i64: 128, 128>}, {pipeline_mode = #tpu.pipeline_mode<synchronous>, transform_indices = @transform_2, window_bounds = array<i64: 1, 128>}, {pipeline_mode = #tpu.pipeline_mode<synchronous>, transform_indices = @transform_3, window_bounds = array<i64: 1, 128>}, {pipeline_mode = #tpu.pipeline_mode<synchronous>, transform_indices = @transform_4, window_bounds = array<i64: 128, 256>}, {pipeline_mode = #tpu.pipeline_mode<synchronous>, transform_indices = @transform_5, window_bounds = array<i64: 1, 256>}, {pipeline_mode = #tpu.pipeline_mode<synchronous>, transform_indices = @transform_6, window_bounds = array<i64: 256, 128>}, {pipeline_mode = #tpu.pipeline_mode<synchronous>, transform_indices = @transform_7, window_bounds = array<i64: 1, 128>}, {pipeline_mode = #tpu.pipeline_mode<synchronous>, transform_indices = @transform_8, window_bounds = array<i64: 1, 128>}, {pipeline_mode = #tpu.pipeline_mode<synchronous>, transform_indices = @transform_9, window_bounds = array<i64: 1, 128>}, {transform_indices = @transform_10, window_bounds = array<i64: 128, 128>}, {transform_indices = @transform_11, window_bounds = array<i64: 128, 128>}]} {
    %c0 = arith.constant 0 : index
    %c0_0 = arith.constant 0 : index
    %0 = vector.load %arg1[%c0, %c0_0] : memref<128x128xf32, #tpu.memory_space<vmem>>, vector<128x128xf32>
    %1 = arith.truncf %0 : vector<128x128xf32> to vector<128x128xbf16>
    %cst = arith.constant dense<0.000000e+00> : vector<128x128xf32>
    %2 = tpu.matmul %1, %1, %cst {dimension_numbers = #tpu.dot_dimension_numbers<[1], [1], [0], [0], [0, 0, 1, 0], [], []>} : vector<128x128xbf16>, vector<128x128xbf16>, vector<128x128xf32> -> vector<128x128xf32>
    %cst_1 = arith.constant 0.0883883461 : f32
    %3 = vector.broadcast %cst_1 : f32 to vector<128x128xf32>
    %4 = arith.mulf %2, %3 : vector<128x128xf32>
    %c0_2 = arith.constant 0 : index
    %c0_3 = arith.constant 0 : index
    %5 = vector.load %arg2[%c0_2, %c0_3] : memref<128x128xf32, #tpu.memory_space<vmem>>, vector<128x128xf32>
    %6 = arith.addf %4, %5 : vector<128x128xf32>
    %cst_4 = arith.constant dense<0xFF800000> : vector<128xf32>
    %7 = vector.multi_reduction <maximumf>, %6, %cst_4 [1] : vector<128x128xf32> to vector<128xf32>
    %8 = vector.shape_cast %7 : vector<128xf32> to vector<128x1xf32>
    %9 = vector.broadcast %8 : vector<128x1xf32> to vector<128x128xf32>
    %10 = arith.subf %6, %9 : vector<128x128xf32>
    %11 = math.exp %10 : vector<128x128xf32>
    %cst_5 = arith.constant dense<0.000000e+00> : vector<128xf32>
    %12 = vector.multi_reduction <add>, %11, %cst_5 [1] : vector<128x128xf32> to vector<128xf32>
    %13 = vector.shape_cast %12 : vector<128xf32> to vector<128x1xf32>
    %14 = tpu.reciprocal %13 {approx = true} : vector<128x1xf32> -> vector<128x1xf32>
    %15 = vector.broadcast %14 : vector<128x1xf32> to vector<128x128xf32>
    %16 = arith.mulf %11, %15 : vector<128x128xf32>
    %17 = arith.truncf %16 : vector<128x128xf32> to vector<128x128xbf16>
    %c0_6 = arith.constant 0 : index
    %c0_7 = arith.constant 0 : index
    %18 = vector.load %arg12[%c0_6, %c0_7] : memref<128x128xbf16, #tpu.memory_space<vmem>>, vector<128x128xbf16>
    tpu.vector_store %arg12[%c0_6, %c0_7], %17 {strides = array<i32>} : memref<128x128xbf16, #tpu.memory_space<vmem>>, vector<128x128xbf16>,
    %cst_8 = arith.constant dense<0.000000e+00> : vector<128x128xf32>
    %19 = tpu.matmul %17, %1, %cst_8 {dimension_numbers = #tpu.dot_dimension_numbers<[1], [0], [0], [1], [0, 0, 1, 1], [], []>} : vector<128x128xbf16>, vector<128x128xbf16>, vector<128x128xf32> -> vector<128x128xf32>
    %20 = arith.addf %0, %19 : vector<128x128xf32>
    %c0_9 = arith.constant 0 : index
    %c0_10 = arith.constant 0 : index
    %21 = vector.load %arg3[%c0_9, %c0_10] : memref<1x128xf32, #tpu.memory_space<vmem>>, vector<1x128xf32>
    %c0_11 = arith.constant 0 : index
    %c0_12 = arith.constant 0 : index
    %22 = vector.load %arg4[%c0_11, %c0_12] : memref<1x128xf32, #tpu.memory_space<vmem>>, vector<1x128xf32>
    %cst_13 = arith.constant dense<0.000000e+00> : vector<128xf32>
    %23 = vector.multi_reduction <add>, %20, %cst_13 [1] : vector<128x128xf32> to vector<128xf32>
    %24 = vector.shape_cast %23 : vector<128xf32> to vector<128x1xf32>
    %cst_14 = arith.constant 1.280000e+02 : f32
    %25 = vector.broadcast %cst_14 : f32 to vector<128x1xf32>
    %26 = arith.divf %24, %25 : vector<128x1xf32>
    %27 = vector.broadcast %26 : vector<128x1xf32> to vector<128x128xf32>
    %28 = arith.subf %20, %27 : vector<128x128xf32>
    %29 = arith.mulf %28, %28 : vector<128x128xf32>
    %cst_15 = arith.constant dense<0.000000e+00> : vector<128xf32>
    %30 = vector.multi_reduction <add>, %29, %cst_15 [1] : vector<128x128xf32> to vector<128xf32>
    %31 = vector.shape_cast %30 : vector<128xf32> to vector<128x1xf32>
    %cst_16 = arith.constant 1.280000e+02 : f32
    %32 = vector.broadcast %cst_16 : f32 to vector<128x1xf32>
    %33 = arith.divf %31, %32 : vector<128x1xf32>
    %cst_17 = arith.constant 9.99999974E-6 : f32
    %34 = vector.broadcast %cst_17 : f32 to vector<128x1xf32>
    %35 = arith.addf %33, %34 : vector<128x1xf32>
    %36 = math.rsqrt %35 : vector<128x1xf32>
    %37 = vector.broadcast %36 : vector<128x1xf32> to vector<128x128xf32>
    %38 = arith.mulf %28, %37 : vector<128x128xf32>
    %39 = vector.broadcast %21 : vector<1x128xf32> to vector<128x128xf32>
    %40 = arith.mulf %38, %39 : vector<128x128xf32>
    %41 = vector.broadcast %22 : vector<1x128xf32> to vector<128x128xf32>
    %42 = arith.addf %40, %41 : vector<128x128xf32>
    %43 = arith.truncf %42 : vector<128x128xf32> to vector<128x128xbf16>
    %c0_18 = arith.constant 0 : index
    %c0_19 = arith.constant 0 : index
    %44 = vector.load %arg5[%c0_18, %c0_19] : memref<128x256xbf16, #tpu.memory_space<vmem>>, vector<128x256xbf16>
    %cst_20 = arith.constant dense<0.000000e+00> : vector<128x256xf32>
    %45 = tpu.matmul %43, %44, %cst_20 {dimension_numbers = #tpu.dot_dimension_numbers<[1], [0], [0], [1], [0, 0, 1, 1], [], []>} : vector<128x128xbf16>, vector<128x256xbf16>, vector<128x256xf32> -> vector<128x256xf32>
    %c0_21 = arith.constant 0 : index
    %c0_22 = arith.constant 0 : index
    %46 = vector.load %arg6[%c0_21, %c0_22] : memref<1x256xf32, #tpu.memory_space<vmem>>, vector<1x256xf32>
    %47 = vector.broadcast %46 : vector<1x256xf32> to vector<128x256xf32>
    %48 = arith.addf %45, %47 : vector<128x256xf32>
    %cst_23 = arith.constant 0.000000e+00 : f32
    %49 = vector.broadcast %cst_23 : f32 to vector<128x256xf32>
    %50 = arith.maximumf %48, %49 : vector<128x256xf32>
    %51 = arith.truncf %50 : vector<128x256xf32> to vector<128x256xbf16>
    %c0_24 = arith.constant 0 : index
    %c0_25 = arith.constant 0 : index
    %52 = vector.load %arg7[%c0_24, %c0_25] : memref<256x128xbf16, #tpu.memory_space<vmem>>, vector<256x128xbf16>
    %cst_26 = arith.constant dense<0.000000e+00> : vector<128x128xf32>
    %53 = tpu.matmul %51, %52, %cst_26 {dimension_numbers = #tpu.dot_dimension_numbers<[1], [0], [0], [1], [0, 0, 1, 1], [], []>} : vector<128x256xbf16>, vector<256x128xbf16>, vector<128x128xf32> -> vector<128x128xf32>
    %c0_27 = arith.constant 0 : index
    %c0_28 = arith.constant 0 : index
    %54 = vector.load %arg8[%c0_27, %c0_28] : memref<1x128xf32, #tpu.memory_space<vmem>>, vector<1x128xf32>
    %55 = vector.broadcast %54 : vector<1x128xf32> to vector<128x128xf32>
    %56 = arith.addf %53, %55 : vector<128x128xf32>
    %57 = arith.addf %42, %56 : vector<128x128xf32>
    %c0_29 = arith.constant 0 : index
    %c0_30 = arith.constant 0 : index
    %58 = vector.load %arg9[%c0_29, %c0_30] : memref<1x128xf32, #tpu.memory_space<vmem>>, vector<1x128xf32>
    %c0_31 = arith.constant 0 : index
    %c0_32 = arith.constant 0 : index
    %59 = vector.load %arg10[%c0_31, %c0_32] : memref<1x128xf32, #tpu.memory_space<vmem>>, vector<1x128xf32>
    %cst_33 = arith.constant dense<0.000000e+00> : vector<128xf32>
    %60 = vector.multi_reduction <add>, %57, %cst_33 [1] : vector<128x128xf32> to vector<128xf32>
    %61 = vector.shape_cast %60 : vector<128xf32> to vector<128x1xf32>
    %cst_34 = arith.constant 1.280000e+02 : f32
    %62 = vector.broadcast %cst_34 : f32 to vector<128x1xf32>
    %63 = arith.divf %61, %62 : vector<128x1xf32>
    %64 = vector.broadcast %63 : vector<128x1xf32> to vector<128x128xf32>
    %65 = arith.subf %57, %64 : vector<128x128xf32>
    %66 = arith.mulf %65, %65 : vector<128x128xf32>
    %cst_35 = arith.constant dense<0.000000e+00> : vector<128xf32>
    %67 = vector.multi_reduction <add>, %66, %cst_35 [1] : vector<128x128xf32> to vector<128xf32>
    %68 = vector.shape_cast %67 : vector<128xf32> to vector<128x1xf32>
    %cst_36 = arith.constant 1.280000e+02 : f32
    %69 = vector.broadcast %cst_36 : f32 to vector<128x1xf32>
    %70 = arith.divf %68, %69 : vector<128x1xf32>
    %cst_37 = arith.constant 9.99999974E-6 : f32
    %71 = vector.broadcast %cst_37 : f32 to vector<128x1xf32>
    %72 = arith.addf %70, %71 : vector<128x1xf32>
    %73 = math.rsqrt %72 : vector<128x1xf32>
    %74 = vector.broadcast %73 : vector<128x1xf32> to vector<128x128xf32>
    %75 = arith.mulf %65, %74 : vector<128x128xf32>
    %76 = vector.broadcast %58 : vector<1x128xf32> to vector<128x128xf32>
    %77 = arith.mulf %75, %76 : vector<128x128xf32>
    %78 = vector.broadcast %59 : vector<1x128xf32> to vector<128x128xf32>
    %79 = arith.addf %77, %78 : vector<128x128xf32>
    %c0_38 = arith.constant 0 : index
    %c0_39 = arith.constant 0 : index
    %80 = vector.load %arg11[%c0_38, %c0_39] : memref<128x128xf32, #tpu.memory_space<vmem>>, vector<128x128xf32>
    tpu.vector_store %arg11[%c0_38, %c0_39], %79 {strides = array<i32>} : memref<128x128xf32, #tpu.memory_space<vmem>>, vector<128x128xf32>,
    return
  }
  func.func @transform_0(%arg0: i32) -> (i32, i32) {
    %c0_i32 = arith.constant 0 : i32
    %c0_i32_0 = arith.constant 0 : i32
    return %arg0, %c0_i32 : i32, i32
  }
  func.func @transform_1(%arg0: i32) -> (i32, i32) {
    %c0_i32 = arith.constant 0 : i32
    %c0_i32_0 = arith.constant 0 : i32
    return %arg0, %c0_i32 : i32, i32
  }
  func.func @transform_2(%arg0: i32) -> (i32, i32) {
    %c0_i32 = arith.constant 0 : i32
    %c0_i32_0 = arith.constant 0 : i32
    %c0_i32_1 = arith.constant 0 : i32
    return %c0_i32, %c0_i32_0 : i32, i32
  }
  func.func @transform_3(%arg0: i32) -> (i32, i32) {
    %c0_i32 = arith.constant 0 : i32
    %c0_i32_0 = arith.constant 0 : i32
    %c0_i32_1 = arith.constant 0 : i32
    return %c0_i32, %c0_i32_0 : i32, i32
  }
  func.func @transform_4(%arg0: i32) -> (i32, i32) {
    %c0_i32 = arith.constant 0 : i32
    %c0_i32_0 = arith.constant 0 : i32
    %c0_i32_1 = arith.constant 0 : i32
    return %c0_i32, %c0_i32_0 : i32, i32
  }
  func.func @transform_5(%arg0: i32) -> (i32, i32) {
    %c0_i32 = arith.constant 0 : i32
    %c0_i32_0 = arith.constant 0 : i32
    %c0_i32_1 = arith.constant 0 : i32
    return %c0_i32, %c0_i32_0 : i32, i32
  }
  func.func @transform_6(%arg0: i32) -> (i32, i32) {
    %c0_i32 = arith.constant 0 : i32
    %c0_i32_0 = arith.constant 0 : i32
    %c0_i32_1 = arith.constant 0 : i32
    return %c0_i32, %c0_i32_0 : i32, i32
  }
  func.func @transform_7(%arg0: i32) -> (i32, i32) {
    %c0_i32 = arith.constant 0 : i32
    %c0_i32_0 = arith.constant 0 : i32
    %c0_i32_1 = arith.constant 0 : i32
    return %c0_i32, %c0_i32_0 : i32, i32
  }
  func.func @transform_8(%arg0: i32) -> (i32, i32) {
    %c0_i32 = arith.constant 0 : i32
    %c0_i32_0 = arith.constant 0 : i32
    %c0_i32_1 = arith.constant 0 : i32
    return %c0_i32, %c0_i32_0 : i32, i32
  }
  func.func @transform_9(%arg0: i32) -> (i32, i32) {
    %c0_i32 = arith.constant 0 : i32
    %c0_i32_0 = arith.constant 0 : i32
    %c0_i32_1 = arith.constant 0 : i32
    return %c0_i32, %c0_i32_0 : i32, i32
  }
  func.func @transform_10(%arg0: i32) -> (i32, i32) {
    %c0_i32 = arith.constant 0 : i32
    %c0_i32_0 = arith.constant 0 : i32
    return %arg0, %c0_i32 : i32, i32
  }
  func.func @transform_11(%arg0: i32) -> (i32, i32) {
    %c0_i32 = arith.constant 0 : i32
    %c0_i32_0 = arith.constant 0 : i32
    return %arg0, %c0_i32 : i32, i32
  }
}

</mosaic_0001>

<bundles_post_ra>
// kernel: tpu_custom_call.1
= control target key start
LH: loop header
LB: loop body
LE: loop exit
PB: predicated region body
PF: predicated region fallthrough
CT: control target
= control target key end

     0   :  { %17 = vsyncpa [#allocation3], 0  ;;  %s3196_s0 = inlined_call_operand.hbm [shape: f32[128,128], index: 0, kind: input, shape index: {}]   ;;  %s3197_s1 = inlined_call_operand.hbm [shape: f32[128,128], index: 1, kind: input, shape index: {}]   ;;  %s3198_s2 = inlined_call_operand.vmem [shape: f32[1,128], index: 2, kind: input, shape index: {}]   ;;  %s3199_s3 = inlined_call_operand.hbm [shape: f32[1,128], index: 3, kind: input, shape index: {}]   ;;  %s3200_s4 = inlined_call_operand.hbm [shape: bf16[128,256], index: 4, kind: input, shape index: {}]   ;;  %s3201_s5 = inlined_call_operand.vmem [shape: f32[1,256], index: 5, kind: input, shape index: {}]   ;;  %s3202_s6 = inlined_call_operand.hbm [shape: bf16[256,128], index: 6, kind: input, shape index: {}]   ;;  %s3203_s7 = inlined_call_operand.vmem [shape: f32[1,128], index: 7, kind: input, shape index: {}]   ;;  %s3204_s8 = inlined_call_operand.vmem [shape: f32[1,128], index: 8, kind: input, shape index: {}]   ;;  %s3205_s9 = inlined_call_operand.vmem [shape: f32[1,128], index: 9, kind: input, shape index: {}]   ;;  %s3206_s10 = inlined_call_operand.hbm [shape: f32[128,128], index: 10, kind: output, shape index: {0}]   ;;  %s3207_s11 = inlined_call_operand.hbm [shape: bf16[128,128], index: 11, kind: output, shape index: {1}]  }
   0x1   :  { %18 = vsyncpa [#allocation6], 0 }
   0x2   :  { %19 = vsyncpa [#allocation9], 0 }
   0x3   :  { %20 = vsyncpa [#allocation4], 0 }
   0x4   :  { %21 = vsyncpa [#allocation13], 0  ;;  %s39_s19 = sshll.u32 %s3197_s1, 4  ;;  %s2358_s20 = smov [#allocation5]   ;;  %s40_s19 = int_to_ptr.hbm [resolvable:$true] %s39_s19 }
   0x5   :  { %s41_s21 = sshll.u32 %s2358_s20, 4  ;;  %s65_s24 = sshll.u32 %s3200_s4, 4  ;;  %s42_s21 = int_to_ptr.vmem [resolvable:$true] %s41_s21  ;;  %s66_s24 = int_to_ptr.hbm [resolvable:$true] %s65_s24 }
   0x6   :  { %s2359_s25 = smov 128   ;;  %s2360_s26 = smov 8  }
   0x7   :  { %47 = dma.hbm_to_vmem [thread:$0]  %s40_s19, 2048, %s42_s21, [#allocation6], %s2359_s25, %s2359_s25, %s2360_s26  }
   0x8   :  { %s2361_s27 = smov [#allocation8]   ;;  %s26_s1 = sshll.u32 %s3196_s0, 4  ;;  %s27_s1 = int_to_ptr.hbm [resolvable:$true] %s26_s1 }
   0x9   :  { %s67_s28 = sshll.u32 %s2361_s27, 4  ;;  %s55_s13 = sshll.u32 %s3199_s3, 4  ;;  %s68_s28 = int_to_ptr.vmem [resolvable:$true] %s67_s28  ;;  %s56_s13 = int_to_ptr.hbm [resolvable:$true] %s55_s13 }
   0xa   :  { %73 = dma.hbm_to_vmem [thread:$0]  %s66_s24, 2048, %s68_s28, [#allocation9], %s2359_s25, %s2359_s25, %s2360_s26  }
   0xb   :  { %s2362_s14 = smov [#allocation2]   ;;  %s2363_s16 = smov [#allocation7]  }
   0xc   :  { %s28_s15 = sshll.u32 %s2362_s14, 4  ;;  %s57_s0 = sshll.u32 %s2363_s16, 4  ;;  %s29_s15 = int_to_ptr.vmem [resolvable:$true] %s28_s15  ;;  %s58_s0 = int_to_ptr.vmem [resolvable:$true] %s57_s0 }
   0xd   :  { %34 = dma.hbm_to_vmem [thread:$0]  %s27_s1, 2048, %s29_s15, [#allocation3], %s2359_s25, %s2359_s25, %s2360_s26  }
   0xe   :  { %s80_s19 = sshll.u32 %s3202_s6, 4  ;;  %s2364_s20 = smov [#allocation10]   ;;  %s81_s19 = int_to_ptr.hbm [resolvable:$true] %s80_s19 }
   0xf   :  { %60 = dma.hbm_to_vmem [thread:$0]  %s56_s13, 16, %s58_s0, [#allocation6]  }
  0x10   :  { %s82_s21 = sshll.u32 %s2364_s20, 4  ;;  %s2365_s3 = smov 64   ;;  %s83_s21 = int_to_ptr.vmem [resolvable:$true] %s82_s21 }
  0x11   :  { %s2366_s22 = smov 4  }
  0x12   :  { %88 = dma.hbm_to_vmem [thread:$0]  %s81_s19, 2048, %s83_s21, [#allocation9], %s2365_s3, %s2365_s3, %s2366_s22  }
  0x13   :  { %2348 = dma.done.wait [#allocation3], 2048  }
  0x14   :  { %2349 = vsyncadd [#allocation3], 4294965248 }
  0x15   :  { %2350 = dma.done.wait [#allocation6], 2064  }
  0x16   :  { %2351 = vsyncadd [#allocation6], 4294965232 }
  0x17   :  { %2352 = dma.done.wait [#allocation9], 4096  }
  0x18   :  { %2353 = vsyncadd [#allocation9], 4294963200  ;;  %v2457_v0 = vld [vmem:[#allocation2 + $0x70] sm:$0xff]  ;;  %v130_v1 = vld [vmem:[#allocation2 + $0x78] sm:$0xff]  ;;  %s1789_s12 = sshll.u32 %s3207_s11, 4  ;;  %s2369_s11 = smov [#allocation11]   ;;  %s1790_s12 = int_to_ptr.hbm [resolvable:$true] %s1789_s12 }
  0x19   :  { %v138_v2 = vpack.c.bf16 %v130_v1, %v2457_v0  ;;  %v2460_v3 = vld [vmem:[#allocation2 + $0x60] sm:$0xff]  ;;  %v2462_v4 = vld [vmem:[#allocation2 + $0x68] sm:$0xff]  ;;  %v2466_v6 = vld [vmem:[#allocation2 + $0x50] sm:$0xff]  ;;  %s1774_s13 = sshll.u32 %s2369_s11, 4  ;;  %s1776_s16 = sshll.u32 %s3206_s10, 4  ;;  %s1775_s13 = int_to_ptr.vmem [resolvable:$true] %s1774_s13  ;;  %s1777_s16 = int_to_ptr.hbm [resolvable:$true] %s1776_s16 }
  0x1a   :  { %v137_v5 = vpack.c.bf16 %v2462_v4, %v2460_v3  ;;  %v2468_v7 = vld [vmem:[#allocation2 + $0x58] sm:$0xff]  ;;  %v2472_v9 = vld [vmem:[#allocation2 + $0x40] sm:$0xff]  ;;  %v2474_v10 = vld [vmem:[#allocation2 + $0x48] sm:$0xff] }
  0x1b   :  { %139 = vmatpush.bf16.xpose.msra.mxu0 %v138_v2  ;;  %460 = vmatpush.bf16.msra.mxu1 %v138_v2  ;;  %v136_v8 = vpack.c.bf16 %v2468_v7, %v2466_v6  ;;  %v135_v11 = vpack.c.bf16 %v2474_v10, %v2472_v9  ;;  %v2478_v12 = vld [vmem:[#allocation2 + $0x30] sm:$0xff]  ;;  %v2480_v13 = vld [vmem:[#allocation2 + $0x38] sm:$0xff]  ;;  %v2484_v15 = vld [vmem:[#allocation2 + $0x20] sm:$0xff] }
  0x1c   :  { %2016 = vmatpush.bf16.msra.mxu3 %v138_v2  ;;  %v134_v14 = vpack.c.bf16 %v2480_v13, %v2478_v12  ;;  %v2486_v16 = vld [vmem:[#allocation2 + $0x28] sm:$0xff]  ;;  %v2490_v18 = vld [vmem:[#allocation2 + $0x10] sm:$0xff]  ;;  %v2492_v19 = vld [vmem:[#allocation2 + $0x18] sm:$0xff] }
  0x1d   :  { %v133_v17 = vpack.c.bf16 %v2486_v16, %v2484_v15  ;;  %v132_v20 = vpack.c.bf16 %v2492_v19, %v2490_v18  ;;  %v2496_v21 = vld [vmem:[#allocation2] sm:$0xff]  ;;  %v2498_v22 = vld [vmem:[#allocation2 + $0x8] sm:$0xff]  ;;  %v206_v33 = vld [vmem:[#allocation5 + $0x10] sm:$0xff] }
  0x1e   :  { %v131_v23 = vpack.c.bf16 %v2498_v22, %v2496_v21  ;;  %v204_v25 = vld [vmem:[#allocation5] sm:$0xff]  ;;  %v205_v29 = vld [vmem:[#allocation5 + $0x8] sm:$0xff]  ;;  %v207_v37 = vld [vmem:[#allocation5 + $0x18] sm:$0xff] }
  0x1f   :  { %461 = vmatpush.bf16.msra.mxu1 %v137_v5  ;;  %v208_v41 = vld [vmem:[#allocation5 + $0x20] sm:$0xff]  ;;  %v209_v45 = vld [vmem:[#allocation5 + $0x28] sm:$0xff]  ;;  %v210_v49 = vld [vmem:[#allocation5 + $0x30] sm:$0xff] }
  0x20   :  { %2017 = vmatpush.bf16.msra.mxu3 %v137_v5  ;;  %v211_v53 = vld [vmem:[#allocation5 + $0x38] sm:$0xff]  ;;  %v212_v57 = vld [vmem:[#allocation5 + $0x40] sm:$0xff] }
  0x23   :  { %140 = vmatpush.bf16.xpose.msra.mxu0 %v137_v5  ;;  %462 = vmatpush.bf16.msra.mxu1 %v136_v8 }
  0x24   :  { %2018 = vmatpush.bf16.msra.mxu3 %v136_v8 }
  0x27   :  { %463 = vmatpush.bf16.msra.mxu1 %v135_v11 }
  0x28   :  { %2019 = vmatpush.bf16.msra.mxu3 %v135_v11 }
  0x2b   :  { %141 = vmatpush.bf16.xpose.msra.mxu0 %v136_v8  ;;  %464 = vmatpush.bf16.msra.mxu1 %v134_v14 }
  0x2c   :  { %2020 = vmatpush.bf16.msra.mxu3 %v134_v14 }
  0x2f   :  { %465 = vmatpush.bf16.msra.mxu1 %v133_v17 }
  0x30   :  { %2021 = vmatpush.bf16.msra.mxu3 %v133_v17 }
  0x33   :  { %142 = vmatpush.bf16.xpose.msra.mxu0 %v135_v11  ;;  %466 = vmatpush.bf16.msra.mxu1 %v132_v20 }
  0x34   :  { %2022 = vmatpush.bf16.msra.mxu3 %v132_v20 }
  0x37   :  { %467 = vmatpush.bf16.msra.mxu1 %v131_v23 }
  0x38   :  { %2023 = vmatpush.bf16.msra.mxu3 %v131_v23 }
  0x3b   :  { %143 = vmatpush.bf16.xpose.msra.mxu0 %v134_v14 }
  0x43   :  { %144 = vmatpush.bf16.xpose.msra.mxu0 %v133_v17 }
  0x4b   :  { %145 = vmatpush.bf16.xpose.msra.mxu0 %v132_v20 }
  0x53   :  { %146 = vmatpush.bf16.xpose.msra.mxu0 %v131_v23 }
  0x5a   :  { %147 = vmatmul.bf16.vlgmr.msra.gmra.mxu0 %v131_v23 }
  0x6a   :  { %152 = vmatmul.bf16.gmra.mxu0 %v132_v20 }
  0x7a   :  { %157 = vmatmul.bf16.gmra.mxu0 %v133_v17  ;;  %v213_v17 = vld [vmem:[#allocation5 + $0x48] sm:$0xff] }
  0x8a   :  { %162 = vmatmul.bf16.gmra.mxu0 %v134_v14 }
  0x9a   :  { %167 = vmatmul.bf16.gmra.mxu0 %v135_v11 }
  0xaa   :  { %172 = vmatmul.bf16.gmra.mxu0 %v136_v8 }
  0xba   :  { %177 = vmatmul.bf16.gmra.mxu0 %v137_v5 }
  0xca   :  { %182 = vmatmul.bf16.gmra.mxu0 %v138_v2 }
  0xd7   :  { %v148_v24 = vpop.f32.mrf.mxu0 }
  0xd8   :  { %v188_v26 = vmul.f32 0.088388346, %v148_v24 }
  0xda   :  { %v220_v27 = vadd.f32 %v204_v25, %v188_v26 }
  0xdc   :  { %236 = vmax.xlane.f32.xlu0 %v220_v27 }
  0xdf   :  { %v150_v28 = vpop.f32.mrf.mxu0 }
  0xe0   :  { %v189_v30 = vmul.f32 0.088388346, %v150_v28 }
  0xe2   :  { %v221_v31 = vadd.f32 %v205_v29, %v189_v30  ;;  %v214_v29 = vld [vmem:[#allocation5 + $0x50] sm:$0xff] }
  0xe4   :  { %238 = vmax.xlane.f32.xlu0 %v221_v31 }
  0xe7   :  { %v153_v32 = vpop.f32.mrf.mxu0 }
  0xe8   :  { %v190_v34 = vmul.f32 0.088388346, %v153_v32 }
  0xea   :  { %v222_v35 = vadd.f32 %v206_v33, %v190_v34 }
  0xec   :  { %240 = vmax.xlane.f32.xlu1 %v222_v35 }
  0xef   :  { %v155_v36 = vpop.f32.mrf.mxu0 }
  0xf0   :  { %v191_v38 = vmul.f32 0.088388346, %v155_v36 }
  0xf2   :  { %v223_v39 = vadd.f32 %v207_v37, %v191_v38  ;;  %v215_v37 = vld [vmem:[#allocation5 + $0x58] sm:$0xff] }
  0xf4   :  { %242 = vmax.xlane.f32.xlu1 %v223_v39 }
  0xf7   :  { %v158_v40 = vpop.f32.mrf.mxu0 }
  0xf8   :  { %v192_v42 = vmul.f32 0.088388346, %v158_v40 }
  0xfa   :  { %v224_v43 = vadd.f32 %v208_v41, %v192_v42 }
  0xfc   :  { %244 = vmax.xlane.f32.xlu2 %v224_v43 }
  0xff   :  { %v160_v44 = vpop.f32.mrf.mxu0 }
 0x100   :  { %v193_v46 = vmul.f32 0.088388346, %v160_v44 }
 0x102   :  { %v2502_v47 = vadd.f32 %v209_v45, %v193_v46  ;;  %v216_v45 = vld [vmem:[#allocation5 + $0x60] sm:$0xff] }
 0x104   :  { %246 = vmax.xlane.f32.xlu2 %v2502_v47 }
 0x107   :  { %v163_v48 = vpop.f32.mrf.mxu0 }
 0x108   :  { %v194_v50 = vmul.f32 0.088388346, %v163_v48 }
 0x10a   :  { %v2505_v51 = vadd.f32 %v210_v49, %v194_v50 }
 0x10c   :  { %248 = vmax.xlane.f32.xlu0 %v2505_v51 }
 0x10f   :  { %v165_v52 = vpop.f32.mrf.mxu0 }
 0x110   :  { %v195_v54 = vmul.f32 0.088388346, %v165_v52 }
 0x112   :  { %v2508_v55 = vadd.f32 %v211_v53, %v195_v54  ;;  %v217_v54 = vld [vmem:[#allocation5 + $0x68] sm:$0xff] }
 0x114   :  { %250 = vmax.xlane.f32.xlu1 %v2508_v55 }
 0x117   :  { %v168_v56 = vpop.f32.mrf.mxu0 }
 0x118   :  { %v196_v58 = vmul.f32 0.088388346, %v168_v56 }
 0x11a   :  { %v2511_v59 = vadd.f32 %v212_v57, %v196_v58 }
 0x11c   :  { %252 = vmax.xlane.f32.xlu1 %v2511_v59 }
 0x11f   :  { %v170_v60 = vpop.f32.mrf.mxu0 }
 0x120   :  { %v197_v14 = vmul.f32 0.088388346, %v170_v60 }
 0x122   :  { %v2517_v23 = vadd.f32 %v213_v17, %v197_v14 }
 0x127   :  { %v173_v1 = vpop.f32.mrf.mxu0 }
 0x128   :  { %v198_v28 = vmul.f32 0.088388346, %v173_v1 }
 0x12f   :  { %v175_v25 = vpop.f32.mrf.mxu0 }
 0x137   :  { %v178_v36 = vpop.f32.mrf.mxu0 }
 0x13f   :  { %v180_v46 = vpop.f32.mrf.mxu0 }
 0x147   :  { %v183_v56 = vpop.f32.mrf.mxu0 }
 0x14f   :  { %v237_v61 = vpop.xlane.xlu0 %236 }
 0x150   :  { %v268_v62 = vsub.f32 %v220_v27, %v237_v61 }
 0x152   :  { %v284_v63 = vmul.f32 1.442695, %v268_v62 }
 0x154   :  { %2049 = vpow2.f32 %v284_v63  ;;  %v218_v63 = vld [vmem:[#allocation5 + $0x70] sm:$0xff] }
 0x157   :  { %v239_v2 = vpop.xlane.xlu0 %238 }
 0x158   :  { %v269_v5 = vsub.f32 %v221_v31, %v239_v2  ;;  %v2523_v31 = vadd.f32 %v214_v29, %v198_v28 }
 0x15a   :  { %v2514_v8 = vpop.eup %2049  ;;  %v286_v11 = vmul.f32 1.442695, %v269_v5 }
 0x15b   :  { %316 = vadd.xlane.f32.xlu2 %v2514_v8 }
 0x15c   :  { %2051 = vpow2.f32 %v286_v11  ;;  %v185_v11 = vpop.f32.mrf.mxu0 }
 0x15f   :  { %v241_v20 = vpop.xlane.xlu1 %240 }
 0x160   :  { %v270_v24 = vsub.f32 %v222_v35, %v241_v20  ;;  %v199_v35 = vmul.f32 0.088388346, %v175_v25  ;;  %v219_v20 = vld [vmem:[#allocation5 + $0x78] sm:$0xff] }
 0x162   :  { %v2519_v26 = vpop.eup %2051  ;;  %v288_v27 = vmul.f32 1.442695, %v270_v24  ;;  %v2529_v40 = vadd.f32 %v215_v37, %v199_v35 }
 0x163   :  { %318 = vadd.xlane.f32.xlu0 %v2519_v26  ;;  %254 = vmax.xlane.f32.xlu2 %v2517_v23 }
 0x164   :  { %2053 = vpow2.f32 %v288_v27 }
 0x167   :  { %v243_v30 = vpop.xlane.xlu1 %242 }
 0x168   :  { %v271_v32 = vsub.f32 %v223_v39, %v243_v30  ;;  %v200_v39 = vmul.f32 0.088388346, %v178_v36 }
 0x16a   :  { %v2525_v33 = vpop.eup %2053  ;;  %v290_v34 = vmul.f32 1.442695, %v271_v32  ;;  %v2535_v49 = vadd.f32 %v216_v45, %v200_v39 }
 0x16b   :  { %320 = vadd.xlane.f32.xlu0 %v2525_v33  ;;  %256 = vmax.xlane.f32.xlu2 %v2523_v31 }
 0x16c   :  { %2055 = vpow2.f32 %v290_v34 }
 0x16f   :  { %v245_v38 = vpop.xlane.xlu2 %244 }
 0x170   :  { %v272_v41 = vsub.f32 %v224_v43, %v245_v38  ;;  %v201_v43 = vmul.f32 0.088388346, %v180_v46 }
 0x172   :  { %v2531_v42 = vpop.eup %2055  ;;  %v292_v44 = vmul.f32 1.442695, %v272_v41  ;;  %v2542_v58 = vadd.f32 %v217_v54, %v201_v43 }
 0x173   :  { %322 = vadd.xlane.f32.xlu1 %v2531_v42  ;;  %258 = vmax.xlane.f32.xlu0 %v2529_v40 }
 0x174   :  { %2057 = vpow2.f32 %v292_v44 }
 0x177   :  { %v247_v48 = vpop.xlane.xlu2 %246 }
 0x178   :  { %v273_v50 = vsub.f32 %v2502_v47, %v247_v48  ;;  %v202_v47 = vmul.f32 0.088388346, %v183_v56 }
 0x17a   :  { %v2538_v52 = vpop.eup %2057  ;;  %v294_v53 = vmul.f32 1.442695, %v273_v50  ;;  %v2549_v2 = vadd.f32 %v218_v63, %v202_v47 }
 0x17b   :  { %324 = vadd.xlane.f32.xlu1 %v2538_v52  ;;  %260 = vmax.xlane.f32.xlu0 %v2535_v49 }
 0x17c   :  { %2059 = vpow2.f32 %v294_v53 }
 0x17f   :  { %v249_v57 = vpop.xlane.xlu0 %248 }
 0x180   :  { %v274_v60 = vsub.f32 %v2505_v51, %v249_v57  ;;  %v203_v51 = vmul.f32 0.088388346, %v185_v11 }
 0x182   :  { %v2545_v61 = vpop.eup %2059  ;;  %v296_v62 = vmul.f32 1.442695, %v274_v60  ;;  %v2556_v25 = vadd.f32 %v219_v20, %v203_v51 }
 0x183   :  { %326 = vadd.xlane.f32.xlu2 %v2545_v61  ;;  %262 = vmax.xlane.f32.xlu1 %v2542_v58 }
 0x184   :  { %2061 = vpow2.f32 %v296_v62 }
 0x187   :  { %v251_v1 = vpop.xlane.xlu1 %250 }
 0x188   :  { %v275_v5 = vsub.f32 %v2508_v55, %v251_v1 }
 0x18a   :  { %v2552_v14 = vpop.eup %2061  ;;  %v298_v17 = vmul.f32 1.442695, %v275_v5 }
 0x18b   :  { %328 = vadd.xlane.f32.xlu2 %v2552_v14  ;;  %264 = vmax.xlane.f32.xlu1 %v2549_v2 }
 0x18c   :  { %2063 = vpow2.f32 %v298_v17 }
 0x18f   :  { %v253_v24 = vpop.xlane.xlu1 %252 }
 0x190   :  { %v276_v27 = vsub.f32 %v2511_v59, %v253_v24 }
 0x192   :  { %v2559_v28 = vpop.eup %2063  ;;  %v300_v29 = vmul.f32 1.442695, %v276_v27 }
 0x193   :  { %330 = vadd.xlane.f32.xlu0 %v2559_v28  ;;  %266 = vmax.xlane.f32.xlu2 %v2556_v25 }
 0x194   :  { %2065 = vpow2.f32 %v300_v29 }
 0x19a   :  { %v2563_v55 = vpop.eup %2065 }
 0x19b   :  { %332 = vadd.xlane.f32.xlu0 %v2563_v55 }
 0x1ce   :  { %v317_v30 = vpop.xlane.xlu2 %316 }
 0x1cf   :  { %2067 = vrcp.f32 %v317_v30 }
 0x1d5   :  { %v2068_v36 = vpop.eup %2067 }
 0x1d6   :  { %v319_v32 = vpop.xlane.xlu0 %318  ;;  %v255_v34 = vpop.xlane.xlu2 %254  ;;  %v364_v37 = vmul.f32 %v2068_v36, %v2514_v8 }
 0x1d7   :  { %2069 = vrcp.f32 %v319_v32  ;;  %v277_v59 = vsub.f32 %v2517_v23, %v255_v34 }
 0x1d8   :  { %v380_v45 = vpack.c.bf16 %v364_v37, %v364_v37 }
 0x1d9   :  { %v302_v35 = vmul.f32 1.442695, %v277_v59 }
 0x1da   :  { %v428_v23 = vunpack.c.l.b16 %v380_v45 }
 0x1db   :  { %2071 = vpow2.f32 %v302_v35 }
 0x1dd   :  { %v2070_v38 = vpop.eup %2069 }
 0x1de   :  { %v321_v41 = vpop.xlane.xlu0 %320  ;;  %v257_v44 = vpop.xlane.xlu2 %256  ;;  %v365_v39 = vmul.f32 %v2070_v38, %v2519_v26 }
 0x1df   :  { %v278_v46 = vsub.f32 %v2523_v31, %v257_v44  ;;  %2073 = vrcp.f32 %v321_v41 }
 0x1e0   :  { %v381_v48 = vpack.c.bf16 %v365_v39, %v365_v39  ;;  %v1972_v50 = vpack.c.bf16 %v365_v39, %v364_v37 }
 0x1e1   :  { %v2570_v53 = vpop.eup %2071  ;;  %v304_v43 = vmul.f32 1.442695, %v278_v46 }
 0x1e2   :  { %334 = vadd.xlane.f32.xlu1 %v2570_v53  ;;  %1973 = vst [vmem:[#allocation12] sm:$0xff] %v1972_v50   ;;  %v429_v8 = vunpack.c.l.b16 %v381_v48 }
 0x1e3   :  { %2075 = vpow2.f32 %v304_v43 }
 0x1e4   :  { %v444_v54 = vpack.c.b16 %v429_v8, %v428_v23 }
 0x1e5   :  { %v2074_v26 = vpop.eup %2073 }
 0x1e6   :  { %468 = vmatmul.bf16.vlgmr.msra.gmra.mxu1 %v444_v54  ;;  %v323_v56 = vpop.xlane.xlu1 %322  ;;  %v259_v57 = vpop.xlane.xlu0 %258  ;;  %v366_v47 = vmul.f32 %v2074_v26, %v2525_v33 }
 0x1e7   :  { %2077 = vrcp.f32 %v323_v56  ;;  %v279_v31 = vsub.f32 %v2529_v40, %v259_v57 }
 0x1e8   :  { %v382_v17 = vpack.c.bf16 %v366_v47, %v366_v47 }
 0x1e9   :  { %v2574_v60 = vpop.eup %2075  ;;  %v306_v62 = vmul.f32 1.442695, %v279_v31 }
 0x1ea   :  { %336 = vadd.xlane.f32.xlu2 %v2574_v60  ;;  %v430_v29 = vunpack.c.l.b16 %v382_v17 }
 0x1eb   :  { %2079 = vpow2.f32 %v306_v62 }
 0x1ed   :  { %v2078_v63 = vpop.eup %2077 }
 0x1ee   :  { %v325_v1 = vpop.xlane.xlu1 %324  ;;  %v261_v5 = vpop.xlane.xlu0 %260  ;;  %v367_v11 = vmul.f32 %v2078_v63, %v2531_v42 }
 0x1ef   :  { %v280_v51 = vsub.f32 %v2535_v49, %v261_v5  ;;  %2081 = vrcp.f32 %v325_v1 }
 0x1f0   :  { %v383_v20 = vpack.c.bf16 %v367_v11, %v367_v11  ;;  %v1977_v24 = vpack.c.bf16 %v367_v11, %v366_v47 }
 0x1f1   :  { %v2580_v27 = vpop.eup %2079  ;;  %v308_v40 = vmul.f32 1.442695, %v280_v51 }
 0x1f2   :  { %338 = vadd.xlane.f32.xlu0 %v2580_v27  ;;  %2009 = vst [vmem:[#allocation12 + $0x8] sm:$0xff] %v1977_v24   ;;  %v431_v33 = vunpack.c.l.b16 %v383_v20 }
 0x1f3   :  { %2083 = vpow2.f32 %v308_v40 }
 0x1f4   :  { %v445_v30 = vpack.c.b16 %v431_v33, %v430_v29 }
 0x1f5   :  { %v2082_v42 = vpop.eup %2081 }
 0x1f6   :  { %473 = vmatmul.bf16.gmra.mxu1 %v445_v30  ;;  %v327_v32 = vpop.xlane.xlu2 %326  ;;  %v263_v34 = vpop.xlane.xlu1 %262  ;;  %v368_v35 = vmul.f32 %v2082_v42, %v2538_v52 }
 0x1f7   :  { %2085 = vrcp.f32 %v327_v32  ;;  %v281_v49 = vsub.f32 %v2542_v58, %v263_v34 }
 0x1f8   :  { %v384_v39 = vpack.c.bf16 %v368_v35, %v368_v35 }
 0x1f9   :  { %v2584_v36 = vpop.eup %2083  ;;  %v310_v59 = vmul.f32 1.442695, %v281_v49 }
 0x1fa   :  { %340 = vadd.xlane.f32.xlu1 %v2584_v36  ;;  %v432_v43 = vunpack.c.l.b16 %v384_v39 }
 0x1fb   :  { %2087 = vpow2.f32 %v310_v59 }
 0x1fd   :  { %v2086_v37 = vpop.eup %2085 }
 0x1fe   :  { %v329_v38 = vpop.xlane.xlu2 %328  ;;  %v265_v41 = vpop.xlane.xlu1 %264  ;;  %v369_v44 = vmul.f32 %v2086_v37, %v2545_v61 }
 0x1ff   :  { %v282_v45 = vsub.f32 %v2549_v2, %v265_v41  ;;  %2089 = vrcp.f32 %v329_v38 }
 0x200   :  { %v385_v46 = vpack.c.bf16 %v369_v44, %v369_v44  ;;  %v1982_v48 = vpack.c.bf16 %v369_v44, %v368_v35 }
 0x201   :  { %v2590_v50 = vpop.eup %2087  ;;  %v312_v58 = vmul.f32 1.442695, %v282_v45 }
 0x202   :  { %342 = vadd.xlane.f32.xlu2 %v2590_v50  ;;  %2010 = vst [vmem:[#allocation12 + $0x10] sm:$0xff] %v1982_v48   ;;  %v433_v52 = vunpack.c.l.b16 %v385_v46 }
 0x203   :  { %2091 = vpow2.f32 %v312_v58 }
 0x204   :  { %v446_v23 = vpack.c.b16 %v433_v52, %v432_v43 }
 0x205   :  { %v2090_v61 = vpop.eup %2089 }
 0x206   :  { %478 = vmatmul.bf16.gmra.mxu1 %v446_v23  ;;  %v331_v8 = vpop.xlane.xlu0 %330  ;;  %v267_v54 = vpop.xlane.xlu2 %266  ;;  %v370_v26 = vmul.f32 %v2090_v61, %v2552_v14 }
 0x207   :  { %2093 = vrcp.f32 %v331_v8  ;;  %v283_v2 = vsub.f32 %v2556_v25, %v267_v54 }
 0x208   :  { %v386_v47 = vpack.c.bf16 %v370_v26, %v370_v26 }
 0x209   :  { %v2594_v56 = vpop.eup %2091  ;;  %v314_v57 = vmul.f32 1.442695, %v283_v2 }
 0x20a   :  { %344 = vadd.xlane.f32.xlu0 %v2594_v56  ;;  %v434_v25 = vunpack.c.l.b16 %v386_v47 }
 0x20b   :  { %2095 = vpow2.f32 %v314_v57 }
 0x20d   :  { %v2094_v31 = vpop.eup %2093 }
 0x20e   :  { %v371_v62 = vmul.f32 %v2094_v31, %v2559_v28  ;;  %v333_v51 = vpop.xlane.xlu0 %332 }
 0x20f   :  { %2097 = vrcp.f32 %v333_v51 }
 0x210   :  { %v387_v63 = vpack.c.bf16 %v371_v62, %v371_v62  ;;  %v1987_v1 = vpack.c.bf16 %v371_v62, %v370_v26 }
 0x211   :  { %v2599_v5 = vpop.eup %2095 }
 0x212   :  { %346 = vadd.xlane.f32.xlu1 %v2599_v5  ;;  %2011 = vst [vmem:[#allocation12 + $0x18] sm:$0xff] %v1987_v1   ;;  %v435_v11 = vunpack.c.l.b16 %v387_v63 }
 0x214   :  { %v447_v17 = vpack.c.b16 %v435_v11, %v434_v25 }
 0x215   :  { %v2098_v14 = vpop.eup %2097 }
 0x216   :  { %483 = vmatmul.bf16.gmra.mxu1 %v447_v17  ;;  %v372_v24 = vmul.f32 %v2098_v14, %v2563_v55 }
 0x218   :  { %v388_v33 = vpack.c.bf16 %v372_v24, %v372_v24 }
 0x21a   :  { %v436_v34 = vunpack.c.l.b16 %v388_v33 }
 0x255   :  { %v335_v20 = vpop.xlane.xlu1 %334 }
 0x256   :  { %2099 = vrcp.f32 %v335_v20 }
 0x25c   :  { %v2100_v28 = vpop.eup %2099 }
 0x25d   :  { %v337_v40 = vpop.xlane.xlu2 %336  ;;  %v373_v29 = vmul.f32 %v2100_v28, %v2570_v53 }
 0x25e   :  { %2101 = vrcp.f32 %v337_v40 }
 0x25f   :  { %v389_v30 = vpack.c.bf16 %v373_v29, %v373_v29  ;;  %v1992_v32 = vpack.c.bf16 %v373_v29, %v372_v24 }
 0x261   :  { %2012 = vst [vmem:[#allocation12 + $0x20] sm:$0xff] %v1992_v32   ;;  %v437_v42 = vunpack.c.l.b16 %v389_v30 }
 0x263   :  { %v469_v49 = vpop.f32.mrf.mxu1  ;;  %v448_v59 = vpack.c.b16 %v437_v42, %v436_v34 }
 0x264   :  { %v2605_v35 = vadd.f32 %v469_v49, %v2496_v21  ;;  %v2102_v38 = vpop.eup %2101 }
 0x265   :  { %v339_v37 = vpop.xlane.xlu0 %338  ;;  %488 = vmatmul.bf16.gmra.mxu1 %v448_v59  ;;  %v374_v55 = vmul.f32 %v2102_v38, %v2574_v60 }
 0x266   :  { %2103 = vrcp.f32 %v339_v37  ;;  %527 = vadd.xlane.f32.xlu2 %v2605_v35 }
 0x267   :  { %v390_v46 = vpack.c.bf16 %v374_v55, %v374_v55 }
 0x269   :  { %v438_v58 = vunpack.c.l.b16 %v390_v46 }
 0x26b   :  { %v471_v53 = vpop.f32.mrf.mxu1 }
 0x26c   :  { %v2104_v41 = vpop.eup %2103  ;;  %v2610_v44 = vadd.f32 %v471_v53, %v2498_v22 }
 0x26d   :  { %v341_v39 = vpop.xlane.xlu1 %340  ;;  %v375_v45 = vmul.f32 %v2104_v41, %v2580_v27 }
 0x26e   :  { %529 = vadd.xlane.f32.xlu0 %v2610_v44  ;;  %2105 = vrcp.f32 %v341_v39 }
 0x26f   :  { %v391_v21 = vpack.c.bf16 %v375_v45, %v375_v45  ;;  %v1997_v48 = vpack.c.bf16 %v375_v45, %v374_v55 }
 0x271   :  { %2013 = vst [vmem:[#allocation12 + $0x28] sm:$0xff] %v1997_v48   ;;  %v439_v43 = vunpack.c.l.b16 %v391_v21 }
 0x273   :  { %v474_v52 = vpop.f32.mrf.mxu1  ;;  %v449_v23 = vpack.c.b16 %v439_v43, %v438_v58 }
 0x274   :  { %v2615_v60 = vadd.f32 %v474_v52, %v2490_v18  ;;  %v2106_v8 = vpop.eup %2105 }
 0x275   :  { %493 = vmatmul.bf16.vlgmr.msra.gmra.mxu3 %v449_v23  ;;  %v343_v22 = vpop.xlane.xlu2 %342  ;;  %v376_v27 = vmul.f32 %v2106_v8, %v2584_v36 }
 0x276   :  { %2107 = vrcp.f32 %v343_v22  ;;  %531 = vadd.xlane.f32.xlu1 %v2615_v60 }
 0x277   :  { %v392_v31 = vpack.c.bf16 %v376_v27, %v376_v27 }
 0x279   :  { %v440_v47 = vunpack.c.l.b16 %v392_v31 }
 0x27b   :  { %v476_v54 = vpop.f32.mrf.mxu1 }
 0x27c   :  { %v2108_v61 = vpop.eup %2107  ;;  %v2620_v2 = vadd.f32 %v476_v54, %v2492_v19 }
 0x27d   :  { %v345_v57 = vpop.xlane.xlu0 %344  ;;  %v377_v26 = vmul.f32 %v2108_v61, %v2590_v50 }
 0x27e   :  { %533 = vadd.xlane.f32.xlu2 %v2620_v2  ;;  %2109 = vrcp.f32 %v345_v57 }
 0x27f   :  { %v393_v18 = vpack.c.bf16 %v377_v26, %v377_v26  ;;  %v2002_v62 = vpack.c.bf16 %v377_v26, %v376_v27 }
 0x281   :  { %2014 = vst [vmem:[#allocation12 + $0x30] sm:$0xff] %v2002_v62   ;;  %v441_v63 = vunpack.c.l.b16 %v393_v18 }
 0x283   :  { %v479_v1 = vpop.f32.mrf.mxu1  ;;  %v450_v25 = vpack.c.b16 %v441_v63, %v440_v47 }
 0x284   :  { %v2625_v36 = vadd.f32 %v479_v1, %v2484_v15  ;;  %v2110_v19 = vpop.eup %2109 }
 0x285   :  { %v347_v11 = vpop.xlane.xlu1 %346  ;;  %498 = vmatmul.bf16.gmra.mxu3 %v450_v25  ;;  %v378_v50 = vmul.f32 %v2110_v19, %v2594_v56  ;;  %v2367_v56 = vmov 128.0  }
 0x286   :  { %2111 = vrcp.f32 %v347_v11  ;;  %535 = vadd.xlane.f32.xlu0 %v2625_v36 }
 0x287   :  { %v394_v24 = vpack.c.bf16 %v378_v50, %v378_v50  ;;  %2113 = vrcp.f32 %v2367_v56  ;;  %v1948_v56 = vld [vmem:[#allocation8 + $0x54] sm:$0xf0] }
 0x289   :  { %v442_v40 = vunpack.c.l.b16 %v394_v24 }
 0x28b   :  { %v481_v17 = vpop.f32.mrf.mxu1 }
 0x28c   :  { %v2112_v51 = vpop.eup %2111  ;;  %v2630_v20 = vadd.f32 %v481_v17, %v2486_v16 }
 0x28d   :  { %v379_v14 = vmul.f32 %v2112_v51, %v2599_v5  ;;  %v2114_v16 = vpop.eup %2113 }
 0x28e   :  { %537 = vadd.xlane.f32.xlu1 %v2630_v20  ;;  %v560_v34 = vmul.f32 128.0, %v2114_v16  ;;  %vm564_vm0 = vweird.f32 %v2114_v16 }
 0x28f   :  { %v395_v15 = vpack.c.bf16 %v379_v14, %v379_v14  ;;  %v2007_v28 = vpack.c.bf16 %v379_v14, %v378_v50  ;;  %v1951_v14 = vld [vmem:[#allocation8 + $0x74] sm:$0xf] }
 0x290   :  { %v561_v42 = vsub.f32 1.0, %v560_v34 }
 0x291   :  { %2015 = vst [vmem:[#allocation12 + $0x38] sm:$0xff] %v2007_v28   ;;  %v443_v29 = vunpack.c.l.b16 %v395_v15  ;;  %v1869_v15 = vld [vmem:[#allocation8 + $0x78] sm:$0xf0] }
 0x292   :  { %v562_v5 = vmul.f32 %v2114_v16, %v561_v42  ;;  %v1872_v28 = vor.u32 %v1951_v14, %v1869_v15  ;;  %v1853_v42 = vld [vmem:[#allocation8 + $0x58] sm:$0xf0] }
 0x293   :  { %v484_v33 = vpop.f32.mrf.mxu1  ;;  %v451_v30 = vpack.c.b16 %v443_v29, %v442_v40  ;;  %v1859_v40 = vld [vmem:[#allocation8 + $0x60] sm:$0xf]  ;;  %v1949_v29 = vld [vmem:[#allocation8 + $0x64] sm:$0xf] }
 0x294   :  { %v515_v32 = vadd.f32 %v484_v33, %v2478_v12  ;;  %v563_v49 = vadd.f32 %v2114_v16, %v562_v5  ;;  %1051 = vmatpush.bf16.msrb.mxu3 %v1872_v28 }
 0x295   :  { %503 = vmatmul.bf16.gmra.mxu3 %v451_v30  ;;  %v1861_v30 = vld [vmem:[#allocation8 + $0x68] sm:$0xf0] }
 0x296   :  { %539 = vadd.xlane.f32.xlu1 %v515_v32  ;;  %v2635_v59 = vsel %vm564_vm0, %v2114_v16, %v563_v49  ;;  %v1947_v16 = vld [vmem:[#allocation8 + $0x54] sm:$0xf]  ;;  %v1843_v49 = vld [vmem:[#allocation8 + $0x40] sm:$0xf] }
 0x297   :  { %v1856_v5 = vor.u32 %v1947_v16, %v1853_v42 }
 0x29b   :  { %v486_v53 = vpop.f32.mrf.mxu1 }
 0x29c   :  { %v2648_v46 = vadd.f32 %v486_v53, %v2480_v13  ;;  %v1845_v53 = vld [vmem:[#allocation8 + $0x48] sm:$0xf0] }
 0x2d9   :  { %v528_v37 = vpop.xlane.xlu2 %527 }
 0x2da   :  { %v566_v38 = vmul.f32 %v2635_v59, %v528_v37  ;;  %v1946_v37 = vld [vmem:[#allocation8 + $0x44] sm:$0xf0] }
 0x2dc   :  { %v2639_v55 = vsub.f32 %v2605_v35, %v566_v38  ;;  %v1945_v38 = vld [vmem:[#allocation8 + $0x44] sm:$0xf] }
 0x2de   :  { %v598_v12 = vmul.f32 %v2639_v55, %v2639_v55 }
 0x2e0   :  { %614 = vadd.xlane.f32.xlu2 %v598_v12  ;;  %v1844_v12 = vor.u32 %v1946_v37, %v1843_v49 }
 0x2e1   :  { %v530_v41 = vpop.xlane.xlu0 %529 }
 0x2e2   :  { %v567_v39 = vmul.f32 %v2635_v59, %v530_v41  ;;  %v489_v35 = vpop.f32.mrf.mxu1  ;;  %v1848_v41 = vor.u32 %v1945_v38, %v1845_v53 }
 0x2e3   :  { %v2658_v52 = vadd.f32 %v489_v35, %v2472_v9  ;;  %v1943_v35 = vld [vmem:[#allocation8 + $0x34] sm:$0xf] }
 0x2e4   :  { %v2645_v45 = vsub.f32 %v2610_v44, %v567_v39  ;;  %v1835_v39 = vld [vmem:[#allocation8 + $0x30] sm:$0xf] }
 0x2e6   :  { %v599_v21 = vmul.f32 %v2645_v45, %v2645_v45 }
 0x2e8   :  { %616 = vadd.xlane.f32.xlu0 %v599_v21  ;;  %541 = vadd.xlane.f32.xlu2 %v2648_v46  ;;  %v1944_v21 = vld [vmem:[#allocation8 + $0x34] sm:$0xf0] }
 0x2e9   :  { %v532_v48 = vpop.xlane.xlu1 %531 }
 0x2ea   :  { %v568_v58 = vmul.f32 %v2635_v59, %v532_v48  ;;  %v491_v22 = vpop.f32.mrf.mxu1  ;;  %v1836_v48 = vor.u32 %v1944_v21, %v1835_v39 }
 0x2eb   :  { %v2668_v27 = vadd.f32 %v491_v22, %v2474_v10  ;;  %v1941_v22 = vld [vmem:[#allocation8 + $0x24] sm:$0xf] }
 0x2ec   :  { %v2655_v43 = vsub.f32 %v2615_v60, %v568_v58  ;;  %v1837_v58 = vld [vmem:[#allocation8 + $0x38] sm:$0xf0] }
 0x2ee   :  { %v600_v13 = vmul.f32 %v2655_v43, %v2655_v43 }
 0x2f0   :  { %618 = vadd.xlane.f32.xlu0 %v600_v13  ;;  %543 = vadd.xlane.f32.xlu2 %v2658_v52  ;;  %v1840_v13 = vor.u32 %v1943_v35, %v1837_v58 }
 0x2f1   :  { %v534_v44 = vpop.xlane.xlu2 %533 }
 0x2f2   :  { %v569_v23 = vmul.f32 %v2635_v59, %v534_v44  ;;  %v1827_v44 = vld [vmem:[#allocation8 + $0x20] sm:$0xf] }
 0x2f4   :  { %v2665_v8 = vsub.f32 %v2620_v2, %v569_v23  ;;  %v1942_v23 = vld [vmem:[#allocation8 + $0x24] sm:$0xf0] }
 0x2f6   :  { %v601_v9 = vmul.f32 %v2665_v8, %v2665_v8 }
 0x2f8   :  { %545 = vadd.xlane.f32.xlu0 %v2668_v27  ;;  %v494_v60 = vpop.f32.mrf.mxu3  ;;  %620 = vadd.xlane.f32.xlu1 %v601_v9  ;;  %v1828_v9 = vor.u32 %v1942_v23, %v1827_v44 }
 0x2f9   :  { %v536_v54 = vpop.xlane.xlu0 %535  ;;  %v2678_v26 = vadd.f32 %v494_v60, %v2466_v6  ;;  %v1829_v60 = vld [vmem:[#allocation8 + $0x28] sm:$0xf0] }
 0x2fa   :  { %v570_v61 = vmul.f32 %v2635_v59, %v536_v54  ;;  %v1832_v54 = vor.u32 %v1941_v22, %v1829_v60 }
 0x2fc   :  { %v2675_v57 = vsub.f32 %v2625_v36, %v570_v61  ;;  %v1819_v61 = vld [vmem:[#allocation8 + $0x10] sm:$0xf] }
 0x2fe   :  { %v602_v10 = vmul.f32 %v2675_v57, %v2675_v57 }
 0x300   :  { %547 = vadd.xlane.f32.xlu0 %v2678_v26  ;;  %v496_v2 = vpop.f32.mrf.mxu3  ;;  %622 = vadd.xlane.f32.xlu1 %v602_v10  ;;  %v1940_v10 = vld [vmem:[#allocation8 + $0x14] sm:$0xf0] }
 0x301   :  { %v538_v31 = vpop.xlane.xlu1 %537  ;;  %v2688_v47 = vadd.f32 %v496_v2, %v2468_v7  ;;  %v1939_v2 = vld [vmem:[#allocation8 + $0x14] sm:$0xf] }
 0x302   :  { %v571_v18 = vmul.f32 %v2635_v59, %v538_v31  ;;  %v1820_v31 = vor.u32 %v1940_v10, %v1819_v61  ;;  %v2734_v61 = vld [vmem:[%s3198_s2] ss:$0 sm:$0xff] }
 0x304   :  { %v2685_v62 = vsub.f32 %v2630_v20, %v571_v18  ;;  %v1952_v20 = vld [vmem:[#allocation8 + $0x74] sm:$0xf0]  ;;  %v1821_v18 = vld [vmem:[#allocation8 + $0x18] sm:$0xf0] }
 0x306   :  { %v603_v6 = vmul.f32 %v2685_v62, %v2685_v62 }
 0x308   :  { %v499_v63 = vpop.f32.mrf.mxu3  ;;  %624 = vadd.xlane.f32.xlu2 %v603_v6  ;;  %549 = vadd.xlane.f32.xlu1 %v2688_v47  ;;  %v1824_v6 = vor.u32 %v1939_v2, %v1821_v18 }
 0x309   :  { %v540_v1 = vpop.xlane.xlu1 %539  ;;  %v2697_v11 = vadd.f32 %v499_v63, %v2460_v3  ;;  %v1867_v3 = vld [vmem:[#allocation8 + $0x70] sm:$0xf] }
 0x30a   :  { %v572_v25 = vmul.f32 %v2635_v59, %v540_v1  ;;  %v1868_v24 = vor.u32 %v1952_v20, %v1867_v3  ;;  %v1813_v3 = vld [vmem:[#allocation8 + $0x8] sm:$0xf0] }
 0x30c   :  { %v2694_v36 = vsub.f32 %v515_v32, %v572_v25  ;;  %1002 = vmatpush.bf16.msrb.mxu0 %v1868_v24  ;;  %2024 = vmatpush.bf16.msra.mxu2 %v1868_v24  ;;  %v1864_v32 = vor.u32 %v1949_v29, %v1861_v30  ;;  %v1811_v25 = vld [vmem:[#allocation8] sm:$0xf] }
 0x30e   :  { %v604_v19 = vmul.f32 %v2694_v36, %v2694_v36  ;;  %1052 = vmatpush.bf16.msrb.mxu3 %v1864_v32 }
 0x310   :  { %626 = vadd.xlane.f32.xlu2 %v604_v19  ;;  %551 = vadd.xlane.f32.xlu1 %v2697_v11  ;;  %v501_v7 = vpop.f32.mrf.mxu3  ;;  %v1938_v19 = vld [vmem:[#allocation8 + $0x4] sm:$0xf0] }
 0x311   :  { %v2703_v50 = vadd.f32 %v501_v7, %v2462_v4  ;;  %v1950_v4 = vld [vmem:[#allocation8 + $0x64] sm:$0xf0]  ;;  %v1937_v7 = vld [vmem:[#allocation8 + $0x4] sm:$0xf] }
 0x312   :  { %v1860_v33 = vor.u32 %v1950_v4, %v1859_v40  ;;  %1053 = vmatpush.bf16.msrb.mxu3 %v1856_v5  ;;  %v1816_v14 = vor.u32 %v1937_v7, %v1813_v3 }
 0x314   :  { %1003 = vmatpush.bf16.msrb.mxu0 %v1860_v33  ;;  %2025 = vmatpush.bf16.msra.mxu2 %v1860_v33 }
 0x316   :  { %1054 = vmatpush.bf16.msrb.mxu3 %v1848_v41 }
 0x318   :  { %553 = vadd.xlane.f32.xlu2 %v2703_v50  ;;  %v504_v17 = vpop.f32.mrf.mxu3 }
 0x319   :  { %v2707_v51 = vadd.f32 %v504_v17, %v2457_v0  ;;  %v1851_v0 = vld [vmem:[#allocation8 + $0x50] sm:$0xf]  ;;  %v1812_v17 = vor.u32 %v1938_v19, %v1811_v25  ;;  %v2743_v25 = vld [vmem:[#allocation7] ss:$0 sm:$0xff] }
 0x31a   :  { %v1852_v34 = vor.u32 %v1948_v56, %v1851_v0  ;;  %1055 = vmatpush.bf16.msrb.mxu3 %v1840_v13 }
 0x31c   :  { %1004 = vmatpush.bf16.msrb.mxu0 %v1852_v34  ;;  %2026 = vmatpush.bf16.msra.mxu2 %v1852_v34 }
 0x31e   :  { %1056 = vmatpush.bf16.msrb.mxu3 %v1832_v54 }
 0x320   :  { %555 = vadd.xlane.f32.xlu2 %v2707_v51  ;;  %1005 = vmatpush.bf16.msrb.mxu0 %v1844_v12  ;;  %v506_v44 = vpop.f32.mrf.mxu3 }
 0x321   :  { %2027 = vmatpush.bf16.msra.mxu2 %v1844_v12 }
 0x322   :  { %1057 = vmatpush.bf16.msrb.mxu3 %v1824_v6 }
 0x324   :  { %1006 = vmatpush.bf16.msrb.mxu0 %v1836_v48 }
 0x325   :  { %2028 = vmatpush.bf16.msra.mxu2 %v1836_v48 }
 0x326   :  { %1058 = vmatpush.bf16.msrb.mxu3 %v1816_v14 }
 0x328   :  { %1007 = vmatpush.bf16.msrb.mxu0 %v1828_v9 }
 0x329   :  { %2029 = vmatpush.bf16.msra.mxu2 %v1828_v9 }
 0x32c   :  { %1008 = vmatpush.bf16.msrb.mxu0 %v1820_v31 }
 0x32d   :  { %2030 = vmatpush.bf16.msra.mxu2 %v1820_v31  ;;  %v2179_v31 = vld [vmem:[#allocation2 + $0x78] sm:$0xff] }
 0x32e   :  { %v2736_v18 = vadd.f32 %v2179_v31, %v506_v44 }
 0x330   :  { %1009 = vmatpush.bf16.msrb.mxu0 %v1812_v17 }
 0x331   :  { %2031 = vmatpush.bf16.msra.mxu2 %v1812_v17 }
 0x353   :  { %v615_v63 = vpop.xlane.xlu2 %614 }
 0x354   :  { %v646_v1 = vmul.f32 %v615_v63, %v2635_v59 }
 0x356   :  { %v662_v20 = vadd.f32 1e-05, %v646_v1 }
 0x358   :  { %2115 = vrsqrt.f32 %v662_v20  ;;  %vm684_vm2 = vweird.f32 %v662_v20 }
 0x35b   :  { %v617_v24 = vpop.xlane.xlu0 %616  ;;  %v542_v15 = vpop.xlane.xlu2 %541 }
 0x35c   :  { %v647_v28 = vmul.f32 %v617_v24, %v2635_v59  ;;  %v573_v40 = vmul.f32 %v2635_v59, %v542_v15 }
 0x35e   :  { %v2116_v4 = vpop.eup %2115  ;;  %v663_v29 = vadd.f32 1e-05, %v647_v28  ;;  %v2714_v33 = vsub.f32 %v2648_v46, %v573_v40 }
 0x35f   :  { %v679_v30 = vmul.f32 %v2116_v4, %v662_v20  ;;  %vm685_vm1 = vweird.f32 %v2116_v4 }
 0x360   :  { %2117 = vrsqrt.f32 %v663_v29  ;;  %v605_v32 = vmul.f32 %v2714_v33, %v2714_v33  ;;  %vm686_vm3 = vmor %vm684_vm2, %vm685_vm1  ;;  %vm694_vm5 = vweird.f32 %v663_v29 }
 0x361   :  { %v680_v0 = vmul.f32 %v2116_v4, %v679_v30 }
 0x362   :  { %628 = vadd.xlane.f32.xlu0 %v605_v32 }
 0x363   :  { %v681_v56 = vmul.f32 0.5, %v680_v0  ;;  %v619_v16 = vpop.xlane.xlu0 %618  ;;  %v544_v34 = vpop.xlane.xlu2 %543 }
 0x364   :  { %v648_v42 = vmul.f32 %v619_v16, %v2635_v59  ;;  %v574_v5 = vmul.f32 %v2635_v59, %v544_v34 }
 0x365   :  { %v682_v49 = vsub.f32 1.5, %v681_v56 }
 0x366   :  { %v2118_v37 = vpop.eup %2117  ;;  %v664_v38 = vadd.f32 1e-05, %v648_v42  ;;  %v2721_v46 = vsub.f32 %v2658_v52, %v574_v5 }
 0x367   :  { %v683_v12 = vmul.f32 %v2116_v4, %v682_v49  ;;  %v689_v53 = vmul.f32 %v2118_v37, %v663_v29  ;;  %vm695_vm4 = vweird.f32 %v2118_v37 }
 0x368   :  { %2119 = vrsqrt.f32 %v664_v38  ;;  %v606_v41 = vmul.f32 %v2721_v46, %v2721_v46  ;;  %vm696_vm6 = vmor %vm694_vm5, %vm695_vm4  ;;  %vm704_vm8 = vweird.f32 %v664_v38 }
 0x369   :  { %v690_v39 = vmul.f32 %v2118_v37, %v689_v53  ;;  %v687_v21 = vsel %vm686_vm3, %v2116_v4, %v683_v12 }
 0x36a   :  { %630 = vadd.xlane.f32.xlu0 %v606_v41  ;;  %v838_v9 = vmul.f32 %v687_v21, %v2639_v55 }
 0x36b   :  { %v691_v35 = vmul.f32 0.5, %v690_v39  ;;  %v546_v48 = vpop.xlane.xlu0 %545  ;;  %v621_v58 = vpop.xlane.xlu1 %620 }
 0x36c   :  { %v575_v13 = vmul.f32 %v2635_v59, %v546_v48  ;;  %v649_v52 = vmul.f32 %v621_v58, %v2635_v59  ;;  %v857_v1 = vmul.f32 %v2734_v61, %v838_v9 }
 0x36d   :  { %v692_v23 = vsub.f32 1.5, %v691_v35 }
 0x36e   :  { %v2120_v22 = vpop.eup %2119  ;;  %v2729_v60 = vsub.f32 %v2668_v27, %v575_v13  ;;  %v665_v54 = vadd.f32 1e-05, %v649_v52  ;;  %v2752_v40 = vadd.f32 %v2743_v25, %v857_v1 }
 0x36f   :  { %v693_v10 = vmul.f32 %v2118_v37, %v692_v23  ;;  %v699_v2 = vmul.f32 %v2120_v22, %v664_v38  ;;  %vm705_vm7 = vweird.f32 %v2120_v22 }
 0x370   :  { %2121 = vrsqrt.f32 %v665_v54  ;;  %v607_v55 = vmul.f32 %v2729_v60, %v2729_v60  ;;  %vm706_vm9 = vmor %vm704_vm8, %vm705_vm7  ;;  %vm714_vm11 = vweird.f32 %v665_v54 }
 0x371   :  { %v697_v6 = vsel %vm696_vm6, %v2118_v37, %v693_v10  ;;  %v700_v27 = vmul.f32 %v2120_v22, %v699_v2 }
 0x372   :  { %v839_v63 = vmul.f32 %v697_v6, %v2645_v45  ;;  %632 = vadd.xlane.f32.xlu1 %v607_v55  ;;  %557 = vadd.xlane.f32.xlu0 %v2736_v18 }
 0x373   :  { %v701_v19 = vmul.f32 0.5, %v700_v27  ;;  %v548_v7 = vpop.xlane.xlu0 %547  ;;  %v623_v17 = vpop.xlane.xlu1 %622 }
 0x374   :  { %v576_v3 = vmul.f32 %v2635_v59, %v548_v7  ;;  %v650_v20 = vmul.f32 %v623_v17, %v2635_v59  ;;  %v858_v14 = vmul.f32 %v2734_v61, %v839_v63 }
 0x375   :  { %v702_v24 = vsub.f32 1.5, %v701_v19 }
 0x376   :  { %v2122_v15 = vpop.eup %2121  ;;  %v2749_v45 = vsub.f32 %v2678_v26, %v576_v3  ;;  %v666_v28 = vadd.f32 1e-05, %v650_v20  ;;  %v2755_v4 = vadd.f32 %v2743_v25, %v858_v14 }
 0x377   :  { %v703_v29 = vmul.f32 %v2120_v22, %v702_v24  ;;  %v709_v30 = vmul.f32 %v2122_v15, %v665_v54  ;;  %vm715_vm10 = vweird.f32 %v2122_v15 }
 0x378   :  { %2123 = vrsqrt.f32 %v666_v28  ;;  %v608_v32 = vmul.f32 %v2749_v45, %v2749_v45  ;;  %v892_v0 = vpack.c.bf16 %v2755_v4, %v2752_v40  ;;  %vm716_vm12 = vmor %vm714_vm11, %vm715_vm10  ;;  %vm724_vm14 = vweird.f32 %v666_v28 }
 0x379   :  { %v710_v26 = vmul.f32 %v2122_v15, %v709_v30  ;;  %v707_v42 = vsel %vm706_vm9, %v2120_v22, %v703_v29 }
 0x37a   :  { %634 = vadd.xlane.f32.xlu1 %v608_v32  ;;  %1010 = vmatmul.bf16.vlgmr.msrb.gmra.mxu0 %v892_v0  ;;  %v840_v41 = vmul.f32 %v707_v42, %v2655_v43  ;;  %v1959_v42 = vld [vmem:[#allocation10 + $0x30] sm:$0xff] }
 0x37b   :  { %v711_v56 = vmul.f32 0.5, %v710_v26  ;;  %1059 = vmatmul.bf16.vlgmr.msrb.gmra.mxu3 %v892_v0  ;;  %v550_v16 = vpop.xlane.xlu1 %549  ;;  %v625_v34 = vpop.xlane.xlu2 %624 }
 0x37c   :  { %v577_v5 = vmul.f32 %v2635_v59, %v550_v16  ;;  %v651_v49 = vmul.f32 %v625_v34, %v2635_v59  ;;  %v859_v52 = vmul.f32 %v2734_v61, %v840_v41 }
 0x37d   :  { %v712_v37 = vsub.f32 1.5, %v711_v56 }
 0x37e   :  { %v2124_v12 = vpop.eup %2123  ;;  %v2764_v53 = vsub.f32 %v2688_v47, %v577_v5  ;;  %v667_v38 = vadd.f32 1e-05, %v651_v49  ;;  %v2777_v2 = vadd.f32 %v2743_v25, %v859_v52  ;;  %v1958_v49 = vld [vmem:[#allocation10 + $0x28] sm:$0xff] }
 0x37f   :  { %v713_v39 = vmul.f32 %v2122_v15, %v712_v37  ;;  %v719_v21 = vmul.f32 %v2124_v12, %v666_v28  ;;  %vm725_vm13 = vweird.f32 %v2124_v12 }
 0x380   :  { %2125 = vrsqrt.f32 %v667_v38  ;;  %v609_v35 = vmul.f32 %v2764_v53, %v2764_v53  ;;  %vm726_vm15 = vmor %vm724_vm14, %vm725_vm13  ;;  %vm734_vm1 = vweird.f32 %v667_v38 }
 0x381   :  { %v720_v48 = vmul.f32 %v2124_v12, %v719_v21  ;;  %v717_v58 = vsel %vm716_vm12, %v2122_v15, %v713_v39  ;;  %v1956_v21 = vld [vmem:[#allocation10 + $0x18] sm:$0xff] }
 0x382   :  { %636 = vadd.xlane.f32.xlu2 %v609_v35  ;;  %v841_v13 = vmul.f32 %v717_v58, %v2665_v8  ;;  %v1955_v58 = vld [vmem:[#allocation10 + $0x10] sm:$0xff] }
 0x383   :  { %v721_v47 = vmul.f32 0.5, %v720_v48  ;;  %v552_v44 = vpop.xlane.xlu1 %551  ;;  %v627_v23 = vpop.xlane.xlu2 %626 }
 0x384   :  { %v578_v43 = vmul.f32 %v2635_v59, %v552_v44  ;;  %v860_v22 = vmul.f32 %v2734_v61, %v841_v13  ;;  %v652_v16 = vmul.f32 %v627_v23, %v2635_v59  ;;  %v1954_v44 = vld [vmem:[#allocation10 + $0x8] sm:$0xff] }
 0x385   :  { %v722_v9 = vsub.f32 1.5, %v721_v47 }
 0x386   :  { %v2126_v54 = vpop.eup %2125  ;;  %v2774_v10 = vsub.f32 %v2697_v11, %v578_v43  ;;  %v2780_v31 = vadd.f32 %v2743_v25, %v860_v22  ;;  %v668_v34 = vadd.f32 1e-05, %v652_v16 }
 0x387   :  { %v723_v8 = vmul.f32 %v2124_v12, %v722_v9  ;;  %v729_v55 = vmul.f32 %v2126_v54, %v667_v38  ;;  %vm735_vm0 = vweird.f32 %v2126_v54 }
 0x388   :  { %v893_v6 = vpack.c.bf16 %v2780_v31, %v2777_v2  ;;  %v610_v27 = vmul.f32 %v2774_v10, %v2774_v10  ;;  %vm736_vm2 = vmor %vm734_vm1, %vm735_vm0  ;;  %2127 = vrsqrt.f32 %v668_v34  ;;  %vm744_vm4 = vweird.f32 %v668_v34 }
 0x389   :  { %v730_v63 = vmul.f32 %v2126_v54, %v729_v55  ;;  %v727_v19 = vsel %vm726_vm15, %v2124_v12, %v723_v8  ;;  %v1957_v12 = vld [vmem:[#allocation10 + $0x20] sm:$0xff] }
 0x38a   :  { %1015 = vmatmul.bf16.gmra.mxu0 %v893_v6  ;;  %638 = vadd.xlane.f32.xlu0 %v610_v27  ;;  %v842_v20 = vmul.f32 %v727_v19, %v2675_v57 }
 0x38b   :  { %v731_v11 = vmul.f32 0.5, %v730_v63  ;;  %1064 = vmatmul.bf16.gmra.mxu3 %v893_v6  ;;  %v554_v1 = vpop.xlane.xlu2 %553 }
 0x38c   :  { %v579_v7 = vmul.f32 %v2635_v59, %v554_v1  ;;  %v861_v29 = vmul.f32 %v2734_v61, %v842_v20 }
 0x38d   :  { %v732_v17 = vsub.f32 1.5, %v731_v11 }
 0x38e   :  { %v2788_v3 = vsub.f32 %v2703_v50, %v579_v7  ;;  %v2801_v57 = vadd.f32 %v2743_v25, %v861_v29  ;;  %v2128_v5 = vpop.eup %2127 }
 0x38f   :  { %v733_v14 = vmul.f32 %v2126_v54, %v732_v17  ;;  %v739_v37 = vmul.f32 %v2128_v5, %v668_v34  ;;  %vm745_vm3 = vweird.f32 %v2128_v5 }
 0x390   :  { %v611_v24 = vmul.f32 %v2788_v3, %v2788_v3  ;;  %vm746_vm5 = vmor %vm744_vm4, %vm745_vm3 }
 0x391   :  { %v737_v15 = vsel %vm736_vm2, %v2126_v54, %v733_v14  ;;  %v740_v38 = vmul.f32 %v2128_v5, %v739_v37  ;;  %v1953_v54 = vld [vmem:[#allocation10] sm:$0xff] }
 0x392   :  { %640 = vadd.xlane.f32.xlu1 %v611_v24  ;;  %v843_v28 = vmul.f32 %v737_v15, %v2685_v62 }
 0x393   :  { %v556_v30 = vpop.xlane.xlu2 %555  ;;  %v741_v48 = vmul.f32 0.5, %v740_v38 }
 0x394   :  { %v580_v32 = vmul.f32 %v2635_v59, %v556_v30  ;;  %v862_v50 = vmul.f32 %v2734_v61, %v843_v28 }
 0x395   :  { %v742_v13 = vsub.f32 1.5, %v741_v48  ;;  %v2837_v48 = vld [vmem:[%s3201_s5] sm:$0x3] }
 0x396   :  { %v2798_v0 = vsub.f32 %v2707_v51, %v580_v32  ;;  %v2804_v26 = vadd.f32 %v2743_v25, %v862_v50  ;;  %v1960_v51 = vld [vmem:[#allocation10 + $0x38] sm:$0xff] }
 0x397   :  { %1280 = vmatpush.bf16.msrb.mxu1 %v1960_v51  ;;  %v743_v22 = vmul.f32 %v2128_v5, %v742_v13 }
 0x398   :  { %v894_v56 = vpack.c.bf16 %v2804_v26, %v2801_v57  ;;  %v612_v62 = vmul.f32 %v2798_v0, %v2798_v0 }
 0x399   :  { %v747_v63 = vsel %vm746_vm5, %v2128_v5, %v743_v22 }
 0x39a   :  { %1020 = vmatmul.bf16.gmra.mxu0 %v894_v56  ;;  %642 = vadd.xlane.f32.xlu2 %v612_v62  ;;  %v844_v14 = vmul.f32 %v747_v63, %v2694_v36 }
 0x39b   :  { %1069 = vmatmul.bf16.gmra.mxu3 %v894_v56  ;;  %1281 = vmatpush.bf16.msrb.mxu1 %v1959_v42 }
 0x39c   :  { %v863_v50 = vmul.f32 %v2734_v61, %v844_v14 }
 0x39e   :  { %v2826_v42 = vadd.f32 %v2743_v25, %v863_v50 }
 0x39f   :  { %1282 = vmatpush.bf16.msrb.mxu1 %v1958_v49 }
 0x3a3   :  { %1283 = vmatpush.bf16.msrb.mxu1 %v1957_v12 }
 0x3a7   :  { %1284 = vmatpush.bf16.msrb.mxu1 %v1956_v21 }
 0x3ab   :  { %1285 = vmatpush.bf16.msrb.mxu1 %v1955_v58 }
 0x3af   :  { %1286 = vmatpush.bf16.msrb.mxu1 %v1954_v44 }
 0x3b3   :  { %1287 = vmatpush.bf16.msrb.mxu1 %v1953_v54 }
 0x3d5   :  { %v629_v41 = vpop.xlane.xlu0 %628 }
 0x3d6   :  { %v653_v39 = vmul.f32 %v629_v41, %v2635_v59 }
 0x3d8   :  { %v669_v35 = vadd.f32 1e-05, %v653_v39 }
 0x3da   :  { %2129 = vrsqrt.f32 %v669_v35  ;;  %vm754_vm7 = vweird.f32 %v669_v35 }
 0x3dd   :  { %v631_v52 = vpop.xlane.xlu0 %630 }
 0x3de   :  { %v654_v47 = vmul.f32 %v631_v52, %v2635_v59 }
 0x3e0   :  { %v2130_v23 = vpop.eup %2129  ;;  %v670_v43 = vadd.f32 1e-05, %v654_v47 }
 0x3e1   :  { %v749_v9 = vmul.f32 %v2130_v23, %v669_v35  ;;  %vm755_vm6 = vweird.f32 %v2130_v23 }
 0x3e2   :  { %2131 = vrsqrt.f32 %v670_v43  ;;  %vm756_vm8 = vmor %vm754_vm7, %vm755_vm6  ;;  %vm764_vm10 = vweird.f32 %v670_v43 }
 0x3e3   :  { %v750_v8 = vmul.f32 %v2130_v23, %v749_v9 }
 0x3e5   :  { %v751_v55 = vmul.f32 0.5, %v750_v8  ;;  %v633_v6 = vpop.xlane.xlu1 %632  ;;  %v558_v27 = vpop.xlane.xlu0 %557 }
 0x3e6   :  { %v655_v11 = vmul.f32 %v633_v6, %v2635_v59  ;;  %v581_v1 = vmul.f32 %v2635_v59, %v558_v27 }
 0x3e7   :  { %v752_v19 = vsub.f32 1.5, %v751_v55 }
 0x3e8   :  { %v2132_v7 = vpop.eup %2131  ;;  %v671_v17 = vadd.f32 1e-05, %v655_v11  ;;  %v2816_v20 = vsub.f32 %v2736_v18, %v581_v1 }
 0x3e9   :  { %v753_v24 = vmul.f32 %v2130_v23, %v752_v19  ;;  %v759_v15 = vmul.f32 %v2132_v7, %v670_v43  ;;  %vm765_vm9 = vweird.f32 %v2132_v7  ;;  %v2841_v43 = vperm.slane %v2837_v48, 0 }
 0x3ea   :  { %2133 = vrsqrt.f32 %v671_v17  ;;  %v613_v28 = vmul.f32 %v2816_v20, %v2816_v20  ;;  %vm766_vm11 = vmor %vm764_vm10, %vm765_vm9  ;;  %vm774_vm13 = vweird.f32 %v671_v17 }
 0x3eb   :  { %v760_v29 = vmul.f32 %v2132_v7, %v759_v15  ;;  %v757_v30 = vsel %vm756_vm8, %v2130_v23, %v753_v24 }
 0x3ec   :  { %644 = vadd.xlane.f32.xlu0 %v613_v28  ;;  %v845_v32 = vmul.f32 %v757_v30, %v2714_v33 }
 0x3ed   :  { %v761_v56 = vmul.f32 0.5, %v760_v29  ;;  %v635_v18 = vpop.xlane.xlu1 %634 }
 0x3ee   :  { %v656_v62 = vmul.f32 %v635_v18, %v2635_v59  ;;  %v864_v36 = vmul.f32 %v2734_v61, %v845_v32 }
 0x3ef   :  { %v762_v16 = vsub.f32 1.5, %v761_v56 }
 0x3f0   :  { %v2134_v34 = vpop.eup %2133  ;;  %v672_v51 = vadd.f32 1e-05, %v656_v62  ;;  %v2829_v5 = vadd.f32 %v2743_v25, %v864_v36 }
 0x3f1   :  { %v763_v49 = vmul.f32 %v2132_v7, %v762_v16  ;;  %v769_v33 = vmul.f32 %v2134_v34, %v671_v17  ;;  %vm775_vm12 = vweird.f32 %v2134_v34 }
 0x3f2   :  { %2135 = vrsqrt.f32 %v672_v51  ;;  %v895_v37 = vpack.c.bf16 %v2829_v5, %v2826_v42  ;;  %vm776_vm14 = vmor %vm774_vm13, %vm775_vm12  ;;  %vm784_vm0 = vweird.f32 %v672_v51 }
 0x3f3   :  { %v770_v12 = vmul.f32 %v2134_v34, %v769_v33  ;;  %v767_v39 = vsel %vm766_vm11, %v2132_v7, %v763_v49 }
 0x3f4   :  { %1025 = vmatmul.bf16.vlgmr.msra.gmra.mxu2 %v895_v37  ;;  %1074 = vmatmul.bf16.gmra.mxu3 %v895_v37  ;;  %v846_v47 = vmul.f32 %v767_v39, %v2721_v46 }
 0x3f5   :  { %v771_v38 = vmul.f32 0.5, %v770_v12  ;;  %v637_v41 = vpop.xlane.xlu2 %636 }
 0x3f6   :  { %v657_v21 = vmul.f32 %v637_v41, %v2635_v59  ;;  %v865_v8 = vmul.f32 %v2734_v61, %v846_v47 }
 0x3f7   :  { %v772_v35 = vsub.f32 1.5, %v771_v38  ;;  %v1011_v58 = vpop.f32.mrf.mxu0  ;;  %v1968_v38 = vld [vmem:[#allocation10 + $0x78] sm:$0xff] }
 0x3f8   :  { %v2136_v13 = vpop.eup %2135  ;;  %v673_v52 = vadd.f32 1e-05, %v657_v21  ;;  %v1012_v27 = vadd.f32 %v1011_v58, %v2841_v43  ;;  %v2850_v14 = vadd.f32 %v2743_v25, %v865_v8  ;;  %1329 = vmatpush.bf16.msrb.mxu2 %v1968_v38  ;;  %v1967_v21 = vld [vmem:[#allocation10 + $0x70] sm:$0xff]  ;;  %v1964_v38 = vld [vmem:[#allocation10 + $0x58] sm:$0xff] }
 0x3f9   :  { %v773_v44 = vmul.f32 %v2134_v34, %v772_v35  ;;  %v779_v23 = vmul.f32 %v2136_v13, %v672_v51  ;;  %vm785_vm15 = vweird.f32 %v2136_v13 }
 0x3fa   :  { %2137 = vrsqrt.f32 %v673_v52  ;;  %v1100_v28 = vmax.f32 %v1012_v27, 0.0  ;;  %vm786_vm1 = vmor %vm784_vm0, %vm785_vm15  ;;  %vm794_vm3 = vweird.f32 %v673_v52 }
 0x3fb   :  { %v780_v22 = vmul.f32 %v2136_v13, %v779_v23  ;;  %v777_v9 = vsel %vm776_vm14, %v2134_v34, %v773_v44 }
 0x3fc   :  { %v847_v54 = vmul.f32 %v777_v9, %v2729_v60  ;;  %1330 = vmatpush.bf16.msrb.mxu2 %v1967_v21 }
 0x3fd   :  { %v781_v55 = vmul.f32 0.5, %v780_v22  ;;  %v639_v6 = vpop.xlane.xlu0 %638 }
 0x3fe   :  { %v658_v46 = vmul.f32 %v639_v6, %v2635_v59  ;;  %v866_v63 = vmul.f32 %v2734_v61, %v847_v54 }
 0x3ff   :  { %v782_v11 = vsub.f32 1.5, %v781_v55  ;;  %v1013_v1 = vpop.f32.mrf.mxu0 }
 0x400   :  { %v2138_v19 = vpop.eup %2137  ;;  %v674_v7 = vadd.f32 1e-05, %v658_v46  ;;  %v1014_v17 = vadd.f32 %v1013_v1, %v2841_v43  ;;  %v2853_v60 = vadd.f32 %v2743_v25, %v866_v63 }
 0x401   :  { %v783_v24 = vmul.f32 %v2136_v13, %v782_v11  ;;  %v789_v15 = vmul.f32 %v2138_v19, %v673_v52  ;;  %vm795_vm2 = vweird.f32 %v2138_v19 }
 0x402   :  { %2139 = vrsqrt.f32 %v674_v7  ;;  %v1102_v29 = vmax.f32 %v1014_v17, 0.0  ;;  %v896_v30 = vpack.c.bf16 %v2853_v60, %v2850_v14  ;;  %vm796_vm4 = vmor %vm794_vm3, %vm795_vm2  ;;  %vm804_vm6 = vweird.f32 %v674_v7 }
 0x403   :  { %v790_v32 = vmul.f32 %v2138_v19, %v789_v15  ;;  %v787_v62 = vsel %vm786_vm1, %v2136_v13, %v783_v24 }
 0x404   :  { %v1132_v50 = vpack.c.bf16 %v1102_v29, %v1100_v28  ;;  %1030 = vmatmul.bf16.gmra.mxu2 %v896_v30  ;;  %1079 = vmatmul.bf16.gmra.mxu3 %v896_v30  ;;  %v848_v37 = vmul.f32 %v787_v62, %v2749_v45 }
 0x405   :  { %v791_v56 = vmul.f32 0.5, %v790_v32  ;;  %v641_v18 = vpop.xlane.xlu1 %640 }
 0x406   :  { %v659_v36 = vmul.f32 %v641_v18, %v2635_v59  ;;  %1288 = vmatmul.bf16.vlgmr.msrb.gmra.mxu1 %v1132_v50  ;;  %v867_v58 = vmul.f32 %v2734_v61, %v848_v37  ;;  %v1966_v37 = vld [vmem:[#allocation10 + $0x68] sm:$0xff] }
 0x407   :  { %v792_v16 = vsub.f32 1.5, %v791_v56  ;;  %v1016_v34 = vpop.f32.mrf.mxu0  ;;  %1331 = vmatpush.bf16.msrb.mxu2 %v1966_v37 }
 0x408   :  { %v2140_v49 = vpop.eup %2139  ;;  %v675_v33 = vadd.f32 1e-05, %v659_v36  ;;  %v1017_v47 = vadd.f32 %v1016_v34, %v2841_v43  ;;  %v2865_v9 = vadd.f32 %v2743_v25, %v867_v58  ;;  %v1060_v58 = vpop.f32.mrf.mxu3 }
 0x409   :  { %v793_v12 = vmul.f32 %v2138_v19, %v792_v16  ;;  %v799_v51 = vmul.f32 %v2140_v49, %v674_v7  ;;  %vm805_vm5 = vweird.f32 %v2140_v49 }
 0x40a   :  { %2141 = vrsqrt.f32 %v675_v33  ;;  %v1104_v55 = vmax.f32 %v1017_v47, 0.0  ;;  %vm806_vm7 = vmor %vm804_vm6, %vm805_vm5  ;;  %vm814_vm9 = vweird.f32 %v675_v33  ;;  %v1963_v47 = vld [vmem:[#allocation10 + $0x50] sm:$0xff] }
 0x40b   :  { %v800_v41 = vmul.f32 %v2140_v49, %v799_v51  ;;  %v797_v39 = vsel %vm796_vm4, %v2138_v19, %v793_v12  ;;  %v1965_v12 = vld [vmem:[#allocation10 + $0x60] sm:$0xff] }
 0x40c   :  { %v849_v35 = vmul.f32 %v797_v39, %v2764_v53  ;;  %1332 = vmatpush.bf16.msrb.mxu2 %v1965_v12 }
 0x40d   :  { %v801_v13 = vmul.f32 0.5, %v800_v41  ;;  %v643_v34 = vpop.xlane.xlu2 %642 }
 0x40e   :  { %v868_v44 = vmul.f32 %v2734_v61, %v849_v35 }
 0x40f   :  { %v802_v45 = vsub.f32 1.5, %v801_v13  ;;  %v1018_v23 = vpop.f32.mrf.mxu0 }
 0x410   :  { %v2142_v52 = vpop.eup %2141  ;;  %v1019_v22 = vadd.f32 %v1018_v23, %v2841_v43  ;;  %v2868_v54 = vadd.f32 %v2743_v25, %v868_v44  ;;  %1333 = vmatpush.bf16.msrb.mxu2 %v1964_v38 }
 0x411   :  { %v803_v53 = vmul.f32 %v2140_v49, %v802_v45  ;;  %v809_v8 = vmul.f32 %v2142_v52, %v675_v33  ;;  %vm815_vm8 = vweird.f32 %v2142_v52  ;;  %v1962_v45 = vld [vmem:[#allocation10 + $0x48] sm:$0xff] }
 0x412   :  { %v1106_v6 = vmax.f32 %v1019_v22, 0.0  ;;  %v897_v27 = vpack.c.bf16 %v2868_v54, %v2865_v9  ;;  %vm816_vm10 = vmor %vm814_vm9, %vm815_vm8  ;;  %v1961_v22 = vld [vmem:[#allocation10 + $0x40] sm:$0xff] }
 0x413   :  { %v810_v46 = vmul.f32 %v2142_v52, %v809_v8  ;;  %v807_v1 = vsel %vm806_vm7, %v2140_v49, %v803_v53  ;;  %v660_v49 = vmul.f32 %v643_v34, %v2635_v59  ;;  %v1062_v53 = vpop.f32.mrf.mxu3 }
 0x414   :  { %1035 = vmatmul.bf16.gmra.mxu2 %v897_v27  ;;  %1084 = vmatmul.bf16.gmra.mxu3 %v897_v27  ;;  %v1134_v63 = vpack.c.bf16 %v1106_v6, %v1104_v55  ;;  %v850_v24 = vmul.f32 %v807_v1, %v2774_v10 }
 0x415   :  { %v811_v11 = vmul.f32 0.5, %v810_v46  ;;  %v676_v33 = vadd.f32 1e-05, %v660_v49  ;;  %1334 = vmatpush.bf16.msrb.mxu2 %v1963_v47 }
 0x416   :  { %1293 = vmatmul.bf16.gmra.mxu1 %v1134_v63  ;;  %v869_v7 = vmul.f32 %v2734_v61, %v850_v24 }
 0x417   :  { %v812_v19 = vsub.f32 1.5, %v811_v11  ;;  %v1021_v17 = vpop.f32.mrf.mxu0  ;;  %2143 = vrsqrt.f32 %v676_v33  ;;  %vm824_vm12 = vweird.f32 %v676_v33 }
 0x418   :  { %v1022_v30 = vadd.f32 %v1021_v17, %v2841_v43  ;;  %v2879_v18 = vadd.f32 %v2743_v25, %v869_v7 }
 0x419   :  { %v813_v15 = vmul.f32 %v2142_v52, %v812_v19  ;;  %1335 = vmatpush.bf16.msrb.mxu2 %v1962_v45 }
 0x41a   :  { %v1108_v62 = vmax.f32 %v1022_v30, 0.0 }
 0x41b   :  { %v817_v28 = vsel %vm816_vm10, %v2142_v52, %v813_v15  ;;  %v1065_v19 = vpop.f32.mrf.mxu3 }
 0x41c   :  { %v851_v29 = vmul.f32 %v817_v28, %v2788_v3 }
 0x41d   :  { %v2144_v51 = vpop.eup %2143  ;;  %1336 = vmatpush.bf16.msrb.mxu2 %v1961_v22 }
 0x41e   :  { %v870_v32 = vmul.f32 %v2734_v61, %v851_v29  ;;  %v819_v41 = vmul.f32 %v2144_v51, %v676_v33  ;;  %vm825_vm11 = vweird.f32 %v2144_v51 }
 0x41f   :  { %v1023_v50 = vpop.f32.mrf.mxu0  ;;  %vm826_vm13 = vmor %vm824_vm12, %vm825_vm11 }
 0x420   :  { %v1024_v56 = vadd.f32 %v1023_v50, %v2841_v43  ;;  %v2882_v10 = vadd.f32 %v2743_v25, %v870_v32  ;;  %v820_v39 = vmul.f32 %v2144_v51, %v819_v41 }
 0x422   :  { %v1110_v36 = vmax.f32 %v1024_v56, 0.0  ;;  %v898_v3 = vpack.c.bf16 %v2882_v10, %v2879_v18  ;;  %v821_v44 = vmul.f32 0.5, %v820_v39 }
 0x423   :  { %v1067_v50 = vpop.f32.mrf.mxu3 }
 0x424   :  { %1040 = vmatmul.bf16.gmra.mxu2 %v898_v3  ;;  %1089 = vmatmul.bf16.gmra.mxu3 %v898_v3  ;;  %v1136_v16 = vpack.c.bf16 %v1110_v36, %v1108_v62  ;;  %v822_v23 = vsub.f32 1.5, %v821_v44  ;;  %v2903_v62 = vperm.slane %v2837_v48, 1 }
 0x426   :  { %1298 = vmatmul.bf16.gmra.mxu1 %v1136_v16  ;;  %v823_v8 = vmul.f32 %v2144_v51, %v822_v23  ;;  %v1063_v3 = vadd.f32 %v1062_v53, %v2903_v62  ;;  %v1061_v16 = vadd.f32 %v1060_v58, %v2903_v62  ;;  %v1066_v58 = vadd.f32 %v1065_v19, %v2903_v62 }
 0x428   :  { %v827_v46 = vsel %vm826_vm13, %v2144_v51, %v823_v8  ;;  %v1103_v49 = vmax.f32 %v1063_v3, 0.0  ;;  %v1101_v37 = vmax.f32 %v1061_v16, 0.0  ;;  %v1105_v45 = vmax.f32 %v1066_v58, 0.0 }
 0x429   :  { %v852_v11 = vmul.f32 %v827_v46, %v2798_v0 }
 0x42a   :  { %v1133_v12 = vpack.c.bf16 %v1103_v49, %v1101_v37 }
 0x42b   :  { %v871_v15 = vmul.f32 %v2734_v61, %v852_v11  ;;  %v1070_v33 = vpop.f32.mrf.mxu3 }
 0x42c   :  { %v1071_v11 = vadd.f32 %v1070_v33, %v2903_v62 }
 0x42d   :  { %v2893_v7 = vadd.f32 %v2743_v25, %v871_v15 }
 0x45f   :  { %v645_v21 = vpop.xlane.xlu0 %644 }
 0x460   :  { %v661_v35 = vmul.f32 %v645_v21, %v2635_v59  ;;  %v1072_v21 = vpop.f32.mrf.mxu3 }
 0x462   :  { %v677_v13 = vadd.f32 1e-05, %v661_v35  ;;  %v1068_v35 = vadd.f32 %v1067_v50, %v2903_v62 }
 0x464   :  { %2145 = vrsqrt.f32 %v677_v13  ;;  %vm834_vm15 = vweird.f32 %v677_v13  ;;  %v1107_v44 = vmax.f32 %v1068_v35, 0.0 }
 0x46a   :  { %v2146_v52 = vpop.eup %2145 }
 0x46b   :  { %v829_v55 = vmul.f32 %v2146_v52, %v677_v13  ;;  %vm835_vm14 = vweird.f32 %v2146_v52 }
 0x46c   :  { %vm836_vm0 = vmor %vm834_vm15, %vm835_vm14 }
 0x46d   :  { %v830_v6 = vmul.f32 %v2146_v52, %v829_v55 }
 0x46f   :  { %v831_v27 = vmul.f32 0.5, %v830_v6 }
 0x471   :  { %v832_v63 = vsub.f32 1.5, %v831_v27  ;;  %v1073_v27 = vadd.f32 %v1072_v21, %v2903_v62 }
 0x473   :  { %v833_v1 = vmul.f32 %v2146_v52, %v832_v63  ;;  %v1111_v19 = vmax.f32 %v1073_v27, 0.0 }
 0x475   :  { %v837_v17 = vsel %vm836_vm0, %v2146_v52, %v833_v1  ;;  %v1135_v52 = vpack.c.bf16 %v1107_v44, %v1105_v45 }
 0x476   :  { %v853_v24 = vmul.f32 %v837_v17, %v2816_v20  ;;  %v1109_v17 = vmax.f32 %v1071_v11, 0.0 }
 0x477   :  { %v1026_v28 = vpop.f32.mrf.mxu2  ;;  %v1075_v23 = vpop.f32.mrf.mxu3 }
 0x478   :  { %v872_v29 = vmul.f32 %v2734_v61, %v853_v24  ;;  %v1027_v32 = vadd.f32 %v1026_v28, %v2841_v43  ;;  %v1137_v24 = vpack.c.bf16 %v1111_v19, %v1109_v17  ;;  %v2932_v17 = vld [vmem:[%s3203_s7] ss:$0 sm:$0xff] }
 0x47a   :  { %v2896_v30 = vadd.f32 %v2743_v25, %v872_v29  ;;  %v1112_v61 = vmax.f32 %v1027_v32, 0.0 }
 0x47c   :  { %v899_v0 = vpack.c.bf16 %v2896_v30, %v2893_v7 }
 0x47e   :  { %1045 = vmatmul.bf16.gmra.mxu2 %v899_v0  ;;  %1094 = vmatmul.bf16.gmra.mxu3 %v899_v0 }
 0x47f   :  { %v1028_v20 = vpop.f32.mrf.mxu2  ;;  %v1077_v63 = vpop.f32.mrf.mxu3 }
 0x480   :  { %v1029_v56 = vadd.f32 %v1028_v20, %v2841_v43  ;;  %v1078_v20 = vadd.f32 %v1077_v63, %v2903_v62 }
 0x482   :  { %v1114_v36 = vmax.f32 %v1029_v56, 0.0 }
 0x484   :  { %v1138_v25 = vpack.c.bf16 %v1114_v36, %v1112_v61  ;;  %v1076_v61 = vadd.f32 %v1075_v23, %v2903_v62  ;;  %v1115_v36 = vmax.f32 %v1078_v20, 0.0 }
 0x486   :  { %1303 = vmatmul.bf16.gmra.mxu1 %v1138_v25  ;;  %v1113_v25 = vmax.f32 %v1076_v61, 0.0 }
 0x487   :  { %v1031_v34 = vpop.f32.mrf.mxu2  ;;  %v1080_v28 = vpop.f32.mrf.mxu3 }
 0x488   :  { %v1032_v51 = vadd.f32 %v1031_v34, %v2841_v43  ;;  %v1139_v16 = vpack.c.bf16 %v1115_v36, %v1113_v25  ;;  %v1081_v33 = vadd.f32 %v1080_v28, %v2903_v62 }
 0x48a   :  { %v1116_v41 = vmax.f32 %v1032_v51, 0.0 }
 0x48e   :  { %1337 = vmatmul.bf16.vlgmr.msrb.gmra.mxu2 %v1133_v12  ;;  %v1117_v12 = vmax.f32 %v1081_v33, 0.0 }
 0x48f   :  { %v1033_v38 = vpop.f32.mrf.mxu2  ;;  %v1082_v3 = vpop.f32.mrf.mxu3 }
 0x490   :  { %v1034_v48 = vadd.f32 %v1033_v38, %v2841_v43  ;;  %v1083_v49 = vadd.f32 %v1082_v3, %v2903_v62 }
 0x492   :  { %v1118_v39 = vmax.f32 %v1034_v48, 0.0  ;;  %v1119_v37 = vmax.f32 %v1083_v49, 0.0 }
 0x494   :  { %v1140_v13 = vpack.c.bf16 %v1118_v39, %v1116_v41  ;;  %v1141_v51 = vpack.c.bf16 %v1119_v37, %v1117_v12 }
 0x496   :  { %1308 = vmatmul.bf16.gmra.mxu1 %v1140_v13 }
 0x497   :  { %v1036_v47 = vpop.f32.mrf.mxu2  ;;  %v1085_v34 = vpop.f32.mrf.mxu3 }
 0x498   :  { %v1037_v22 = vadd.f32 %v1036_v47, %v2841_v43  ;;  %v1086_v41 = vadd.f32 %v1085_v34, %v2903_v62 }
 0x49a   :  { %v1120_v55 = vmax.f32 %v1037_v22, 0.0  ;;  %v1121_v35 = vmax.f32 %v1086_v41, 0.0  ;;  %v1289_v22 = vpop.f32.mrf.mxu1 }
 0x49e   :  { %1342 = vmatmul.bf16.gmra.mxu2 %v1135_v52 }
 0x49f   :  { %v1038_v53 = vpop.f32.mrf.mxu2  ;;  %v1087_v38 = vpop.f32.mrf.mxu3 }
 0x4a0   :  { %v1039_v8 = vadd.f32 %v1038_v53, %v2841_v43  ;;  %v1088_v48 = vadd.f32 %v1087_v38, %v2903_v62 }
 0x4a2   :  { %v1122_v6 = vmax.f32 %v1039_v8, 0.0  ;;  %v1123_v21 = vmax.f32 %v1088_v48, 0.0  ;;  %v1291_v53 = vpop.f32.mrf.mxu1 }
 0x4a3   :  { %v1292_v61 = vadd.f32 %v2932_v17, %v1291_v53 }
 0x4a4   :  { %v1142_v46 = vpack.c.bf16 %v1122_v6, %v1120_v55  ;;  %v1143_v13 = vpack.c.bf16 %v1123_v21, %v1121_v35 }
 0x4a6   :  { %1313 = vmatmul.bf16.gmra.mxu1 %v1142_v46 }
 0x4a7   :  { %v1041_v1 = vpop.f32.mrf.mxu2  ;;  %v1090_v39 = vpop.f32.mrf.mxu3 }
 0x4a8   :  { %v1042_v15 = vadd.f32 %v1041_v1, %v2841_v43  ;;  %v1091_v44 = vadd.f32 %v1090_v39, %v2903_v62 }
 0x4aa   :  { %v1124_v32 = vmax.f32 %v1042_v15, 0.0  ;;  %v1125_v23 = vmax.f32 %v1091_v44, 0.0  ;;  %v1294_v6 = vpop.f32.mrf.mxu1 }
 0x4ab   :  { %v1295_v34 = vadd.f32 %v2932_v17, %v1294_v6 }
 0x4ae   :  { %1347 = vmatmul.bf16.gmra.mxu2 %v1137_v24 }
 0x4af   :  { %v1043_v29 = vpop.f32.mrf.mxu2  ;;  %v1092_v58 = vpop.f32.mrf.mxu3 }
 0x4b0   :  { %v1044_v0 = vadd.f32 %v1043_v29, %v2841_v43  ;;  %v1093_v47 = vadd.f32 %v1092_v58, %v2903_v62 }
 0x4b2   :  { %v1126_v50 = vmax.f32 %v1044_v0, 0.0  ;;  %v1127_v45 = vmax.f32 %v1093_v47, 0.0 }
 0x4b4   :  { %v1144_v56 = vpack.c.bf16 %v1126_v50, %v1124_v32  ;;  %v1145_v52 = vpack.c.bf16 %v1127_v45, %v1125_v23  ;;  %v1290_v50 = vadd.f32 %v2932_v17, %v1289_v22 }
 0x4b6   :  { %1318 = vmatmul.bf16.gmra.mxu1 %v1144_v56 }
 0x4be   :  { %1352 = vmatmul.bf16.gmra.mxu2 %v1139_v16 }
 0x4ce   :  { %1357 = vmatmul.bf16.gmra.mxu2 %v1141_v51 }
 0x4de   :  { %1362 = vmatmul.bf16.gmra.mxu2 %v1143_v13 }
 0x4ee   :  { %1367 = vmatmul.bf16.gmra.mxu2 %v1145_v52 }
 0x501   :  { %v1046_v8 = vpop.f32.mrf.mxu2  ;;  %v1095_v55 = vpop.f32.mrf.mxu3 }
 0x502   :  { %v1047_v27 = vadd.f32 %v1046_v8, %v2841_v43  ;;  %v1096_v46 = vadd.f32 %v1095_v55, %v2903_v62 }
 0x504   :  { %v1128_v24 = vmax.f32 %v1047_v27, 0.0  ;;  %v1129_v15 = vmax.f32 %v1096_v46, 0.0 }
 0x509   :  { %v1048_v63 = vpop.f32.mrf.mxu2  ;;  %v1097_v11 = vpop.f32.mrf.mxu3 }
 0x50a   :  { %v1049_v1 = vadd.f32 %v1048_v63, %v2841_v43  ;;  %v1098_v19 = vadd.f32 %v1097_v11, %v2903_v62  ;;  %v1296_v43 = vpop.f32.mrf.mxu1 }
 0x50b   :  { %v1297_v12 = vadd.f32 %v2932_v17, %v1296_v43 }
 0x50c   :  { %v1130_v28 = vmax.f32 %v1049_v1, 0.0  ;;  %v1131_v29 = vmax.f32 %v1098_v19, 0.0 }
 0x50e   :  { %v1146_v0 = vpack.c.bf16 %v1130_v28, %v1128_v24  ;;  %v1147_v32 = vpack.c.bf16 %v1131_v29, %v1129_v15 }
 0x510   :  { %1323 = vmatmul.bf16.gmra.mxu1 %v1146_v0  ;;  %1372 = vmatmul.bf16.gmra.mxu2 %v1147_v32 }
 0x511   :  { %v1338_v20 = vpop.f32.mrf.mxu2 }
 0x512   :  { %v1339_v56 = vadd.f32 %v1338_v20, %v1290_v50  ;;  %v1299_v16 = vpop.f32.mrf.mxu1 }
 0x513   :  { %v1300_v41 = vadd.f32 %v2932_v17, %v1299_v16 }
 0x514   :  { %v2936_v62 = vadd.f32 %v1339_v56, %v2752_v40 }
 0x516   :  { %1396 = vadd.xlane.f32.xlu1 %v2936_v62 }
 0x519   :  { %v1340_v36 = vpop.f32.mrf.mxu2 }
 0x51a   :  { %v1341_v3 = vadd.f32 %v1340_v36, %v1292_v61  ;;  %v1301_v40 = vpop.f32.mrf.mxu1 }
 0x51b   :  { %v1302_v35 = vadd.f32 %v2932_v17, %v1301_v40 }
 0x51c   :  { %v2941_v25 = vadd.f32 %v1341_v3, %v2755_v4 }
 0x51e   :  { %1398 = vadd.xlane.f32.xlu2 %v2941_v25 }
 0x521   :  { %v1343_v49 = vpop.f32.mrf.mxu2 }
 0x522   :  { %v1344_v33 = vadd.f32 %v1343_v49, %v1295_v34  ;;  %v1304_v48 = vpop.f32.mrf.mxu1 }
 0x523   :  { %v1305_v44 = vadd.f32 %v2932_v17, %v1304_v48 }
 0x524   :  { %v2946_v37 = vadd.f32 %v1344_v33, %v2777_v2 }
 0x526   :  { %1400 = vadd.xlane.f32.xlu0 %v2946_v37 }
 0x529   :  { %v1345_v51 = vpop.f32.mrf.mxu2 }
 0x52a   :  { %v1346_v38 = vadd.f32 %v1345_v51, %v1297_v12  ;;  %v1306_v13 = vpop.f32.mrf.mxu1 }
 0x52b   :  { %v1307_v22 = vadd.f32 %v2932_v17, %v1306_v13 }
 0x52c   :  { %v2951_v4 = vadd.f32 %v1346_v38, %v2780_v31 }
 0x52e   :  { %1402 = vadd.xlane.f32.xlu1 %v2951_v4 }
 0x531   :  { %v1348_v39 = vpop.f32.mrf.mxu2 }
 0x532   :  { %v1349_v21 = vadd.f32 %v1348_v39, %v1300_v41  ;;  %v1309_v52 = vpop.f32.mrf.mxu1 }
 0x533   :  { %v1310_v6 = vadd.f32 %v2932_v17, %v1309_v52 }
 0x534   :  { %v2956_v2 = vadd.f32 %v1349_v21, %v2801_v57 }
 0x536   :  { %1404 = vadd.xlane.f32.xlu2 %v2956_v2 }
 0x539   :  { %v1350_v58 = vpop.f32.mrf.mxu2 }
 0x53a   :  { %v1351_v47 = vadd.f32 %v1350_v58, %v1302_v35 }
 0x53c   :  { %v2961_v31 = vadd.f32 %v1351_v47, %v2804_v26  ;;  %v1311_v26 = vpop.f32.mrf.mxu1 }
 0x53d   :  { %v1312_v11 = vadd.f32 %v2932_v17, %v1311_v26 }
 0x53e   :  { %1406 = vadd.xlane.f32.xlu0 %v2961_v31 }
 0x541   :  { %v1353_v45 = vpop.f32.mrf.mxu2 }
 0x542   :  { %v1354_v23 = vadd.f32 %v1353_v45, %v1305_v44 }
 0x544   :  { %v2966_v57 = vadd.f32 %v1354_v23, %v2826_v42  ;;  %v1314_v42 = vpop.f32.mrf.mxu1 }
 0x545   :  { %v1315_v24 = vadd.f32 %v2932_v17, %v1314_v42 }
 0x546   :  { %1408 = vadd.xlane.f32.xlu1 %v2966_v57 }
 0x549   :  { %v1355_v53 = vpop.f32.mrf.mxu2 }
 0x54a   :  { %v1356_v8 = vadd.f32 %v1355_v53, %v1307_v22 }
 0x54c   :  { %v2971_v55 = vadd.f32 %v1356_v8, %v2829_v5  ;;  %v1316_v15 = vpop.f32.mrf.mxu1 }
 0x54d   :  { %v1317_v0 = vadd.f32 %v2932_v17, %v1316_v15 }
 0x54e   :  { %1410 = vadd.xlane.f32.xlu2 %v2971_v55 }
 0x551   :  { %v1358_v27 = vpop.f32.mrf.mxu2 }
 0x552   :  { %v1359_v46 = vadd.f32 %v1358_v27, %v1310_v6 }
 0x554   :  { %v2976_v63 = vadd.f32 %v1359_v46, %v2850_v14  ;;  %v1319_v20 = vpop.f32.mrf.mxu1 }
 0x555   :  { %v1320_v56 = vadd.f32 %v2932_v17, %v1319_v20 }
 0x556   :  { %1412 = vadd.xlane.f32.xlu0 %v2976_v63 }
 0x559   :  { %v1360_v1 = vpop.f32.mrf.mxu2 }
 0x55a   :  { %v1361_v19 = vadd.f32 %v1360_v1, %v1312_v11 }
 0x55c   :  { %v2981_v5 = vadd.f32 %v1361_v19, %v2853_v60 }
 0x55e   :  { %1414 = vadd.xlane.f32.xlu1 %v2981_v5 }
 0x561   :  { %v1363_v28 = vpop.f32.mrf.mxu2 }
 0x562   :  { %v1364_v29 = vadd.f32 %v1363_v28, %v1315_v24 }
 0x564   :  { %v2986_v14 = vadd.f32 %v1364_v29, %v2865_v9  ;;  %v1321_v9 = vpop.f32.mrf.mxu1 }
 0x565   :  { %v1322_v3 = vadd.f32 %v2932_v17, %v1321_v9 }
 0x566   :  { %1416 = vadd.xlane.f32.xlu2 %v2986_v14 }
 0x569   :  { %v1365_v32 = vpop.f32.mrf.mxu2 }
 0x56a   :  { %v1366_v50 = vadd.f32 %v1365_v32, %v1317_v0 }
 0x56c   :  { %v2991_v60 = vadd.f32 %v1366_v50, %v2868_v54 }
 0x56e   :  { %1418 = vadd.xlane.f32.xlu0 %v2991_v60 }
 0x571   :  { %v1368_v43 = vpop.f32.mrf.mxu2 }
 0x572   :  { %v1369_v61 = vadd.f32 %v1368_v43, %v1320_v56 }
 0x574   :  { %v2996_v36 = vadd.f32 %v1369_v61, %v2879_v18 }
 0x576   :  { %1420 = vadd.xlane.f32.xlu1 %v2996_v36 }
 0x579   :  { %v1370_v16 = vpop.f32.mrf.mxu2 }
 0x57a   :  { %v1371_v34 = vadd.f32 %v1370_v16, %v1322_v3 }
 0x57c   :  { %v3001_v49 = vadd.f32 %v1371_v34, %v2882_v10 }
 0x57e   :  { %1422 = vadd.xlane.f32.xlu2 %v3001_v49 }
 0x589   :  { %v1397_v54 = vpop.xlane.xlu1 %1396 }
 0x58a   :  { %v1428_v33 = vmul.f32 %v1397_v54, %v2635_v59 }
 0x58c   :  { %v3006_v40 = vsub.f32 %v2936_v62, %v1428_v33 }
 0x58d   :  { %v1324_v18 = vpop.f32.mrf.mxu1 }
 0x58e   :  { %v1460_v12 = vmul.f32 %v3006_v40, %v3006_v40  ;;  %v1325_v51 = vadd.f32 %v2932_v17, %v1324_v18 }
 0x590   :  { %1476 = vadd.xlane.f32.xlu2 %v1460_v12 }
 0x591   :  { %v1399_v38 = vpop.xlane.xlu2 %1398 }
 0x592   :  { %v1429_v10 = vmul.f32 %v1399_v38, %v2635_v59 }
 0x593   :  { %v1373_v48 = vpop.f32.mrf.mxu2 }
 0x594   :  { %v1374_v41 = vadd.f32 %v1373_v48, %v1325_v51  ;;  %v3017_v62 = vsub.f32 %v2941_v25, %v1429_v10 }
 0x595   :  { %v1326_v21 = vpop.f32.mrf.mxu1 }
 0x596   :  { %v3013_v39 = vadd.f32 %v1374_v41, %v2893_v7  ;;  %v1327_v35 = vadd.f32 %v2932_v17, %v1326_v21  ;;  %v1461_v7 = vmul.f32 %v3017_v62, %v3017_v62 }
 0x598   :  { %1424 = vadd.xlane.f32.xlu0 %v3013_v39 }
 0x599   :  { %v1401_v13 = vpop.xlane.xlu0 %1400 }
 0x59a   :  { %v1430_v44 = vmul.f32 %v1401_v13, %v2635_v59 }
 0x59b   :  { %v1375_v58 = vpop.f32.mrf.mxu2 }
 0x59c   :  { %v1376_v47 = vadd.f32 %v1375_v58, %v1327_v35  ;;  %v3028_v25 = vsub.f32 %v2946_v37, %v1430_v44 }
 0x59e   :  { %v3022_v45 = vadd.f32 %v1376_v47, %v2896_v30  ;;  %v1462_v30 = vmul.f32 %v3028_v25, %v3028_v25 }
 0x5a0   :  { %1426 = vadd.xlane.f32.xlu1 %v3022_v45  ;;  %1478 = vadd.xlane.f32.xlu0 %v1461_v7 }
 0x5a1   :  { %v1403_v23 = vpop.xlane.xlu1 %1402 }
 0x5a2   :  { %v1431_v17 = vmul.f32 %v1403_v23, %v2635_v59 }
 0x5a4   :  { %v3032_v52 = vsub.f32 %v2951_v4, %v1431_v17 }
 0x5a6   :  { %v1463_v22 = vmul.f32 %v3032_v52, %v3032_v52 }
 0x5a8   :  { %1482 = vadd.xlane.f32.xlu2 %v1463_v22  ;;  %1480 = vadd.xlane.f32.xlu1 %v1462_v30 }
 0x5a9   :  { %v1405_v53 = vpop.xlane.xlu2 %1404 }
 0x5aa   :  { %v1432_v8 = vmul.f32 %v1405_v53, %v2635_v59 }
 0x5ac   :  { %v3040_v26 = vsub.f32 %v2956_v2, %v1432_v8  ;;  %v3113_v8 = vld [vmem:[%s3204_s8] ss:$0 sm:$0xff]  ;;  %s2368_s8 = smov [#allocation12]  }
 0x5ae   :  { %v1464_v37 = vmul.f32 %v3040_v26, %v3040_v26 }
 0x5b0   :  { %1484 = vadd.xlane.f32.xlu0 %v1464_v37 }
 0x5b1   :  { %v1407_v4 = vpop.xlane.xlu0 %1406 }
 0x5b2   :  { %v1433_v6 = vmul.f32 %v1407_v4, %v2635_v59 }
 0x5b4   :  { %v3046_v27 = vsub.f32 %v2961_v31, %v1433_v6  ;;  %v3120_v6 = vld [vmem:[%s3205_s9] ss:$0 sm:$0xff]  ;;  %s1787_s9 = sshll.u32 %s2368_s8, 4  ;;  %s1788_s9 = int_to_ptr.vmem [resolvable:$true] %s1787_s9 }
 0x5b5   :  { %1795 = dma.vmem_to_hbm [thread:$0]  %s1788_s9, 1024, %s1790_s12, [#allocation13], %s2365_s3, %s2365_s3, %s2366_s22  }
 0x5b6   :  { %v1465_v46 = vmul.f32 %v3046_v27, %v3046_v27 }
 0x5b8   :  { %1486 = vadd.xlane.f32.xlu1 %v1465_v46 }
 0x5b9   :  { %v1409_v42 = vpop.xlane.xlu1 %1408 }
 0x5ba   :  { %v1434_v11 = vmul.f32 %v1409_v42, %v2635_v59 }
 0x5bc   :  { %v3052_v2 = vsub.f32 %v2966_v57, %v1434_v11 }
 0x5be   :  { %v1466_v1 = vmul.f32 %v3052_v2, %v3052_v2 }
 0x5c0   :  { %1488 = vadd.xlane.f32.xlu2 %v1466_v1 }
 0x5c1   :  { %v1411_v19 = vpop.xlane.xlu2 %1410 }
 0x5c2   :  { %v1435_v24 = vmul.f32 %v1411_v19, %v2635_v59 }
 0x5c4   :  { %v3058_v31 = vsub.f32 %v2971_v55, %v1435_v24 }
 0x5c6   :  { %v1467_v15 = vmul.f32 %v3058_v31, %v3058_v31 }
 0x5c8   :  { %1490 = vadd.xlane.f32.xlu0 %v1467_v15 }
 0x5c9   :  { %v1413_v28 = vpop.xlane.xlu0 %1412 }
 0x5ca   :  { %v1436_v29 = vmul.f32 %v1413_v28, %v2635_v59 }
 0x5cc   :  { %v3064_v57 = vsub.f32 %v2976_v63, %v1436_v29 }
 0x5ce   :  { %v1468_v0 = vmul.f32 %v3064_v57, %v3064_v57 }
 0x5d0   :  { %1492 = vadd.xlane.f32.xlu1 %v1468_v0 }
 0x5d1   :  { %v1415_v32 = vpop.xlane.xlu1 %1414 }
 0x5d2   :  { %v1437_v50 = vmul.f32 %v1415_v32, %v2635_v59 }
 0x5d4   :  { %v3070_v55 = vsub.f32 %v2981_v5, %v1437_v50 }
 0x5d6   :  { %v1469_v20 = vmul.f32 %v3070_v55, %v3070_v55 }
 0x5d8   :  { %1494 = vadd.xlane.f32.xlu2 %v1469_v20 }
 0x5d9   :  { %v1417_v56 = vpop.xlane.xlu2 %1416 }
 0x5da   :  { %v1438_v43 = vmul.f32 %v1417_v56, %v2635_v59 }
 0x5dc   :  { %v3076_v63 = vsub.f32 %v2986_v14, %v1438_v43 }
 0x5de   :  { %v1470_v61 = vmul.f32 %v3076_v63, %v3076_v63 }
 0x5e0   :  { %1496 = vadd.xlane.f32.xlu0 %v1470_v61 }
 0x5e1   :  { %v1419_v9 = vpop.xlane.xlu0 %1418 }
 0x5e2   :  { %v1439_v3 = vmul.f32 %v1419_v9, %v2635_v59 }
 0x5e4   :  { %v3082_v5 = vsub.f32 %v2991_v60, %v1439_v3 }
 0x5e6   :  { %v1471_v16 = vmul.f32 %v3082_v5, %v3082_v5 }
 0x5e8   :  { %1498 = vadd.xlane.f32.xlu1 %v1471_v16 }
 0x5e9   :  { %v1421_v34 = vpop.xlane.xlu1 %1420 }
 0x5ea   :  { %v1440_v54 = vmul.f32 %v1421_v34, %v2635_v59 }
 0x5ec   :  { %v3088_v14 = vsub.f32 %v2996_v36, %v1440_v54 }
 0x5ee   :  { %v1472_v33 = vmul.f32 %v3088_v14, %v3088_v14 }
 0x5f0   :  { %1500 = vadd.xlane.f32.xlu2 %v1472_v33 }
 0x5f1   :  { %v1423_v18 = vpop.xlane.xlu2 %1422 }
 0x5f2   :  { %v1441_v12 = vmul.f32 %v1423_v18, %v2635_v59 }
 0x5f4   :  { %v3094_v60 = vsub.f32 %v3001_v49, %v1441_v12 }
 0x5f6   :  { %v1473_v51 = vmul.f32 %v3094_v60, %v3094_v60 }
 0x5f8   :  { %1502 = vadd.xlane.f32.xlu0 %v1473_v51 }
 0x603   :  { %v1477_v38 = vpop.xlane.xlu2 %1476 }
 0x604   :  { %v1508_v48 = vmul.f32 %v1477_v38, %v2635_v59 }
 0x606   :  { %v1524_v41 = vadd.f32 1e-05, %v1508_v48 }
 0x608   :  { %2147 = vrsqrt.f32 %v1524_v41  ;;  %vm1546_vm2 = vweird.f32 %v1524_v41 }
 0x60b   :  { %v1425_v36 = vpop.xlane.xlu0 %1424 }
 0x60c   :  { %v1442_v10 = vmul.f32 %v1425_v36, %v2635_v59 }
 0x60e   :  { %v2148_v21 = vpop.eup %2147  ;;  %v3101_v35 = vsub.f32 %v3013_v39, %v1442_v10 }
 0x60f   :  { %v1541_v13 = vmul.f32 %v2148_v21, %v1524_v41  ;;  %vm1547_vm1 = vweird.f32 %v2148_v21 }
 0x610   :  { %v1474_v49 = vmul.f32 %v3101_v35, %v3101_v35  ;;  %vm1548_vm3 = vmor %vm1546_vm2, %vm1547_vm1 }
 0x611   :  { %v1542_v58 = vmul.f32 %v2148_v21, %v1541_v13 }
 0x612   :  { %1504 = vadd.xlane.f32.xlu1 %v1474_v49 }
 0x613   :  { %v1543_v47 = vmul.f32 0.5, %v1542_v58  ;;  %v1427_v44 = vpop.xlane.xlu1 %1426  ;;  %v1479_v7 = vpop.xlane.xlu0 %1478 }
 0x614   :  { %v1443_v23 = vmul.f32 %v1427_v44, %v2635_v59  ;;  %v1509_v17 = vmul.f32 %v1479_v7, %v2635_v59 }
 0x615   :  { %v1544_v22 = vsub.f32 1.5, %v1543_v47 }
 0x616   :  { %v3108_v30 = vsub.f32 %v3022_v45, %v1443_v23  ;;  %v1525_v39 = vadd.f32 1e-05, %v1509_v17 }
 0x617   :  { %v1545_v53 = vmul.f32 %v2148_v21, %v1544_v22 }
 0x618   :  { %2149 = vrsqrt.f32 %v1525_v39  ;;  %v1475_v37 = vmul.f32 %v3108_v30, %v3108_v30  ;;  %vm1556_vm5 = vweird.f32 %v1525_v39 }
 0x619   :  { %v1549_v4 = vsel %vm1548_vm3, %v2148_v21, %v1545_v53 }
 0x61a   :  { %v1700_v45 = vmul.f32 %v1549_v4, %v3006_v40  ;;  %1506 = vadd.xlane.f32.xlu2 %v1475_v37 }
 0x61b   :  { %v1483_v46 = vpop.xlane.xlu2 %1482  ;;  %v1481_v42 = vpop.xlane.xlu1 %1480 }
 0x61c   :  { %v1719_v11 = vmul.f32 %v3113_v8, %v1700_v45  ;;  %v1511_v1 = vmul.f32 %v1483_v46, %v2635_v59  ;;  %v1510_v19 = vmul.f32 %v1481_v42, %v2635_v59 }
 0x61e   :  { %v2150_v24 = vpop.eup %2149  ;;  %v1738_v15 = vadd.f32 %v3120_v6, %v1719_v11  ;;  %v1527_v28 = vadd.f32 1e-05, %v1511_v1  ;;  %v1526_v29 = vadd.f32 1e-05, %v1510_v19 }
 0x61f   :  { %v1551_v0 = vmul.f32 %v2150_v24, %v1525_v39  ;;  %vm1557_vm4 = vweird.f32 %v2150_v24 }
 0x620   :  { %1754 = vst [vmem:[#allocation11] sm:$0xff] %v1738_v15  ;;  %2151 = vrsqrt.f32 %v1527_v28  ;;  %vm1558_vm6 = vmor %vm1556_vm5, %vm1557_vm4  ;;  %vm1576_vm9 = vweird.f32 %v1527_v28  ;;  %vm1566_vm11 = vweird.f32 %v1526_v29 }
 0x621   :  { %v1552_v32 = vmul.f32 %v2150_v24, %v1551_v0  ;;  %2153 = vrsqrt.f32 %v1526_v29 }
 0x623   :  { %v1553_v40 = vmul.f32 0.5, %v1552_v32  ;;  %v1485_v50 = vpop.xlane.xlu0 %1484 }
 0x624   :  { %v1512_v20 = vmul.f32 %v1485_v50, %v2635_v59 }
 0x625   :  { %v1554_v56 = vsub.f32 1.5, %v1553_v40 }
 0x626   :  { %v2152_v43 = vpop.eup %2151  ;;  %v1528_v61 = vadd.f32 1e-05, %v1512_v20 }
 0x627   :  { %v2154_v9 = vpop.eup %2153  ;;  %v1555_v3 = vmul.f32 %v2150_v24, %v1554_v56  ;;  %v1571_v16 = vmul.f32 %v2152_v43, %v1527_v28  ;;  %vm1577_vm7 = vweird.f32 %v2152_v43 }
 0x628   :  { %v1561_v34 = vmul.f32 %v2154_v9, %v1526_v29  ;;  %2155 = vrsqrt.f32 %v1528_v61  ;;  %vm1567_vm8 = vweird.f32 %v2154_v9  ;;  %vm1578_vm10 = vmor %vm1576_vm9, %vm1577_vm7  ;;  %vm1586_vm14 = vweird.f32 %v1528_v61 }
 0x629   :  { %v1559_v54 = vsel %vm1558_vm6, %v2150_v24, %v1555_v3  ;;  %v1572_v33 = vmul.f32 %v2152_v43, %v1571_v16  ;;  %vm1568_vm12 = vmor %vm1566_vm11, %vm1567_vm8 }
 0x62a   :  { %v1701_v18 = vmul.f32 %v1559_v54, %v3017_v62  ;;  %v1562_v12 = vmul.f32 %v2154_v9, %v1561_v34 }
 0x62b   :  { %v1573_v51 = vmul.f32 0.5, %v1572_v33  ;;  %v1487_v38 = vpop.xlane.xlu1 %1486 }
 0x62c   :  { %v1720_v48 = vmul.f32 %v3113_v8, %v1701_v18  ;;  %v1563_v41 = vmul.f32 0.5, %v1562_v12  ;;  %v1513_v36 = vmul.f32 %v1487_v38, %v2635_v59 }
 0x62d   :  { %v1574_v10 = vsub.f32 1.5, %v1573_v51 }
 0x62e   :  { %v2156_v21 = vpop.eup %2155  ;;  %v1739_v62 = vadd.f32 %v3120_v6, %v1720_v48  ;;  %v1564_v13 = vsub.f32 1.5, %v1563_v41  ;;  %v1529_v49 = vadd.f32 1e-05, %v1513_v36 }
 0x62f   :  { %v1575_v58 = vmul.f32 %v2152_v43, %v1574_v10  ;;  %v1581_v47 = vmul.f32 %v2156_v21, %v1528_v61  ;;  %vm1587_vm13 = vweird.f32 %v2156_v21 }
 0x630   :  { %1755 = vst [vmem:[#allocation11 + $0x8] sm:$0xff] %v1739_v62  ;;  %v1565_v44 = vmul.f32 %v2154_v9, %v1564_v13  ;;  %2157 = vrsqrt.f32 %v1529_v49  ;;  %vm1588_vm15 = vmor %vm1586_vm14, %vm1587_vm13  ;;  %vm1596_vm1 = vweird.f32 %v1529_v49 }
 0x631   :  { %v1579_v7 = vsel %vm1578_vm10, %v2152_v43, %v1575_v58  ;;  %v1582_v23 = vmul.f32 %v2156_v21, %v1581_v47 }
 0x632   :  { %v1703_v17 = vmul.f32 %v1579_v7, %v3032_v52  ;;  %v1569_v22 = vsel %vm1568_vm12, %v2154_v9, %v1565_v44 }
 0x633   :  { %v1702_v39 = vmul.f32 %v1569_v22, %v3028_v25  ;;  %v1583_v53 = vmul.f32 0.5, %v1582_v23  ;;  %v1489_v37 = vpop.xlane.xlu2 %1488 }
 0x634   :  { %v1722_v4 = vmul.f32 %v3113_v8, %v1703_v17  ;;  %v1514_v45 = vmul.f32 %v1489_v37, %v2635_v59 }
 0x635   :  { %v1721_v46 = vmul.f32 %v3113_v8, %v1702_v39  ;;  %v1584_v42 = vsub.f32 1.5, %v1583_v53 }
 0x636   :  { %v2158_v11 = vpop.eup %2157  ;;  %v1741_v1 = vadd.f32 %v3120_v6, %v1722_v4  ;;  %v1530_v19 = vadd.f32 1e-05, %v1514_v45 }
 0x637   :  { %v1740_v24 = vadd.f32 %v3120_v6, %v1721_v46  ;;  %v1585_v52 = vmul.f32 %v2156_v21, %v1584_v42  ;;  %v1591_v15 = vmul.f32 %v2158_v11, %v1529_v49  ;;  %vm1597_vm0 = vweird.f32 %v2158_v11 }
 0x638   :  { %1757 = vst [vmem:[#allocation11 + $0x18] sm:$0xff] %v1741_v1  ;;  %2159 = vrsqrt.f32 %v1530_v19  ;;  %vm1598_vm2 = vmor %vm1596_vm1, %vm1597_vm0  ;;  %vm1606_vm4 = vweird.f32 %v1530_v19 }
 0x639   :  { %1756 = vst [vmem:[#allocation11 + $0x10] sm:$0xff] %v1740_v24  ;;  %v1589_v25 = vsel %vm1588_vm15, %v2156_v21, %v1585_v52  ;;  %v1592_v28 = vmul.f32 %v2158_v11, %v1591_v15 }
 0x63a   :  { %v1704_v29 = vmul.f32 %v1589_v25, %v3040_v26 }
 0x63b   :  { %v1593_v0 = vmul.f32 0.5, %v1592_v28  ;;  %v1491_v32 = vpop.xlane.xlu0 %1490 }
 0x63c   :  { %v1723_v40 = vmul.f32 %v3113_v8, %v1704_v29  ;;  %v1515_v50 = vmul.f32 %v1491_v32, %v2635_v59 }
 0x63d   :  { %v1594_v20 = vsub.f32 1.5, %v1593_v0 }
 0x63e   :  { %v2160_v56 = vpop.eup %2159  ;;  %v1742_v43 = vadd.f32 %v3120_v6, %v1723_v40  ;;  %v1531_v61 = vadd.f32 1e-05, %v1515_v50 }
 0x63f   :  { %v1595_v9 = vmul.f32 %v2158_v11, %v1594_v20  ;;  %v1601_v3 = vmul.f32 %v2160_v56, %v1530_v19  ;;  %vm1607_vm3 = vweird.f32 %v2160_v56 }
 0x640   :  { %1758 = vst [vmem:[#allocation11 + $0x20] sm:$0xff] %v1742_v43  ;;  %2161 = vrsqrt.f32 %v1531_v61  ;;  %vm1608_vm5 = vmor %vm1606_vm4, %vm1607_vm3  ;;  %vm1616_vm7 = vweird.f32 %v1531_v61 }
 0x641   :  { %v1599_v16 = vsel %vm1598_vm2, %v2158_v11, %v1595_v9  ;;  %v1602_v26 = vmul.f32 %v2160_v56, %v1601_v3 }
 0x642   :  { %v1705_v34 = vmul.f32 %v1599_v16, %v3046_v27 }
 0x643   :  { %v1603_v54 = vmul.f32 0.5, %v1602_v26  ;;  %v1493_v33 = vpop.xlane.xlu1 %1492 }
 0x644   :  { %v1724_v18 = vmul.f32 %v3113_v8, %v1705_v34  ;;  %v1516_v12 = vmul.f32 %v1493_v33, %v2635_v59 }
 0x645   :  { %v1604_v51 = vsub.f32 1.5, %v1603_v54 }
 0x646   :  { %v2162_v38 = vpop.eup %2161  ;;  %v1743_v48 = vadd.f32 %v3120_v6, %v1724_v18  ;;  %v1532_v41 = vadd.f32 1e-05, %v1516_v12 }
 0x647   :  { %v1605_v36 = vmul.f32 %v2160_v56, %v1604_v51  ;;  %v1611_v10 = vmul.f32 %v2162_v38, %v1531_v61  ;;  %vm1617_vm6 = vweird.f32 %v2162_v38 }
 0x648   :  { %1759 = vst [vmem:[#allocation11 + $0x28] sm:$0xff] %v1743_v48  ;;  %2163 = vrsqrt.f32 %v1532_v41  ;;  %vm1618_vm8 = vmor %vm1616_vm7, %vm1617_vm6  ;;  %vm1626_vm10 = vweird.f32 %v1532_v41 }
 0x649   :  { %v1609_v21 = vsel %vm1608_vm5, %v2160_v56, %v1605_v36  ;;  %v1612_v27 = vmul.f32 %v2162_v38, %v1611_v10 }
 0x64a   :  { %v1706_v62 = vmul.f32 %v1609_v21, %v3052_v2 }
 0x64b   :  { %v1613_v13 = vmul.f32 0.5, %v1612_v27  ;;  %v1495_v49 = vpop.xlane.xlu2 %1494 }
 0x64c   :  { %v1725_v58 = vmul.f32 %v3113_v8, %v1706_v62  ;;  %v1517_v47 = vmul.f32 %v1495_v49, %v2635_v59 }
 0x64d   :  { %v1614_v44 = vsub.f32 1.5, %v1613_v13 }
 0x64e   :  { %v2164_v7 = vpop.eup %2163  ;;  %v1744_v23 = vadd.f32 %v3120_v6, %v1725_v58  ;;  %v1533_v17 = vadd.f32 1e-05, %v1517_v47 }
 0x64f   :  { %v1615_v22 = vmul.f32 %v2162_v38, %v1614_v44  ;;  %v1621_v39 = vmul.f32 %v2164_v7, %v1532_v41  ;;  %vm1627_vm9 = vweird.f32 %v2164_v7 }
 0x650   :  { %1760 = vst [vmem:[#allocation11 + $0x30] sm:$0xff] %v1744_v23  ;;  %2165 = vrsqrt.f32 %v1533_v17  ;;  %vm1628_vm11 = vmor %vm1626_vm10, %vm1627_vm9  ;;  %vm1636_vm13 = vweird.f32 %v1533_v17 }
 0x651   :  { %v1619_v53 = vsel %vm1618_vm8, %v2162_v38, %v1615_v22  ;;  %v1622_v2 = vmul.f32 %v2164_v7, %v1621_v39 }
 0x652   :  { %v1707_v37 = vmul.f32 %v1619_v53, %v3058_v31 }
 0x653   :  { %v1623_v4 = vmul.f32 0.5, %v1622_v2  ;;  %v1497_v45 = vpop.xlane.xlu0 %1496 }
 0x654   :  { %v1726_v46 = vmul.f32 %v3113_v8, %v1707_v37  ;;  %v1518_v42 = vmul.f32 %v1497_v45, %v2635_v59 }
 0x655   :  { %v1624_v11 = vsub.f32 1.5, %v1623_v4 }
 0x656   :  { %v2166_v1 = vpop.eup %2165  ;;  %v1745_v19 = vadd.f32 %v3120_v6, %v1726_v46  ;;  %v1534_v24 = vadd.f32 1e-05, %v1518_v42 }
 0x657   :  { %v1625_v52 = vmul.f32 %v2164_v7, %v1624_v11  ;;  %v1631_v15 = vmul.f32 %v2166_v1, %v1533_v17  ;;  %vm1637_vm12 = vweird.f32 %v2166_v1 }
 0x658   :  { %1761 = vst [vmem:[#allocation11 + $0x38] sm:$0xff] %v1745_v19  ;;  %2167 = vrsqrt.f32 %v1534_v24  ;;  %vm1638_vm14 = vmor %vm1636_vm13, %vm1637_vm12  ;;  %vm1646_vm0 = vweird.f32 %v1534_v24 }
 0x659   :  { %v1629_v25 = vsel %vm1628_vm11, %v2164_v7, %v1625_v52  ;;  %v1632_v31 = vmul.f32 %v2166_v1, %v1631_v15 }
 0x65a   :  { %v1708_v28 = vmul.f32 %v1629_v25, %v3064_v57 }
 0x65b   :  { %v1633_v29 = vmul.f32 0.5, %v1632_v31  ;;  %v1499_v0 = vpop.xlane.xlu1 %1498 }
 0x65c   :  { %v1727_v32 = vmul.f32 %v3113_v8, %v1708_v28  ;;  %v1519_v40 = vmul.f32 %v1499_v0, %v2635_v59 }
 0x65d   :  { %v1634_v50 = vsub.f32 1.5, %v1633_v29 }
 0x65e   :  { %v2168_v20 = vpop.eup %2167  ;;  %v1746_v56 = vadd.f32 %v3120_v6, %v1727_v32  ;;  %v1535_v43 = vadd.f32 1e-05, %v1519_v40 }
 0x65f   :  { %v1635_v61 = vmul.f32 %v2166_v1, %v1634_v50  ;;  %v1641_v9 = vmul.f32 %v2168_v20, %v1534_v24  ;;  %vm1647_vm15 = vweird.f32 %v2168_v20 }
 0x660   :  { %1762 = vst [vmem:[#allocation11 + $0x40] sm:$0xff] %v1746_v56  ;;  %2169 = vrsqrt.f32 %v1535_v43  ;;  %vm1648_vm1 = vmor %vm1646_vm0, %vm1647_vm15  ;;  %vm1656_vm3 = vweird.f32 %v1535_v43 }
 0x661   :  { %v1639_v3 = vsel %vm1638_vm14, %v2166_v1, %v1635_v61  ;;  %v1642_v57 = vmul.f32 %v2168_v20, %v1641_v9 }
 0x662   :  { %v1709_v16 = vmul.f32 %v1639_v3, %v3070_v55 }
 0x663   :  { %v1643_v26 = vmul.f32 0.5, %v1642_v57  ;;  %v1501_v34 = vpop.xlane.xlu2 %1500 }
 0x664   :  { %v1728_v54 = vmul.f32 %v3113_v8, %v1709_v16  ;;  %v1520_v33 = vmul.f32 %v1501_v34, %v2635_v59 }
 0x665   :  { %v1644_v18 = vsub.f32 1.5, %v1643_v26 }
 0x666   :  { %v2170_v12 = vpop.eup %2169  ;;  %v1747_v51 = vadd.f32 %v3120_v6, %v1728_v54  ;;  %v1536_v38 = vadd.f32 1e-05, %v1520_v33 }
 0x667   :  { %v1645_v48 = vmul.f32 %v2168_v20, %v1644_v18  ;;  %v1651_v41 = vmul.f32 %v2170_v12, %v1535_v43  ;;  %vm1657_vm2 = vweird.f32 %v2170_v12 }
 0x668   :  { %1763 = vst [vmem:[#allocation11 + $0x48] sm:$0xff] %v1747_v51  ;;  %2171 = vrsqrt.f32 %v1536_v38  ;;  %vm1658_vm4 = vmor %vm1656_vm3, %vm1657_vm2  ;;  %vm1666_vm6 = vweird.f32 %v1536_v38 }
 0x669   :  { %v1649_v36 = vsel %vm1648_vm1, %v2168_v20, %v1645_v48  ;;  %v1652_v55 = vmul.f32 %v2170_v12, %v1651_v41 }
 0x66a   :  { %v1710_v10 = vmul.f32 %v1649_v36, %v3076_v63 }
 0x66b   :  { %v1653_v21 = vmul.f32 0.5, %v1652_v55  ;;  %v1503_v27 = vpop.xlane.xlu0 %1502 }
 0x66c   :  { %v1729_v62 = vmul.f32 %v3113_v8, %v1710_v10  ;;  %v1521_v13 = vmul.f32 %v1503_v27, %v2635_v59 }
 0x66d   :  { %v1654_v49 = vsub.f32 1.5, %v1653_v21 }
 0x66e   :  { %v2172_v58 = vpop.eup %2171  ;;  %v1748_v47 = vadd.f32 %v3120_v6, %v1729_v62  ;;  %v1537_v44 = vadd.f32 1e-05, %v1521_v13 }
 0x66f   :  { %v1655_v7 = vmul.f32 %v2170_v12, %v1654_v49  ;;  %v1661_v23 = vmul.f32 %v2172_v58, %v1536_v38  ;;  %vm1667_vm5 = vweird.f32 %v2172_v58 }
 0x670   :  { %1764 = vst [vmem:[#allocation11 + $0x50] sm:$0xff] %v1748_v47  ;;  %2173 = vrsqrt.f32 %v1537_v44  ;;  %vm1668_vm7 = vmor %vm1666_vm6, %vm1667_vm5  ;;  %vm1676_vm9 = vweird.f32 %v1537_v44 }
 0x671   :  { %v1659_v17 = vsel %vm1658_vm4, %v2170_v12, %v1655_v7  ;;  %v1662_v63 = vmul.f32 %v2172_v58, %v1661_v23 }
 0x672   :  { %v1711_v22 = vmul.f32 %v1659_v17, %v3082_v5 }
 0x673   :  { %v1663_v39 = vmul.f32 0.5, %v1662_v63 }
 0x674   :  { %v1730_v53 = vmul.f32 %v3113_v8, %v1711_v22 }
 0x675   :  { %v1664_v2 = vsub.f32 1.5, %v1663_v39 }
 0x676   :  { %v2174_v37 = vpop.eup %2173  ;;  %v1749_v4 = vadd.f32 %v3120_v6, %v1730_v53 }
 0x677   :  { %v1665_v45 = vmul.f32 %v2172_v58, %v1664_v2  ;;  %v1671_v46 = vmul.f32 %v2174_v37, %v1537_v44  ;;  %vm1677_vm8 = vweird.f32 %v2174_v37 }
 0x678   :  { %1765 = vst [vmem:[#allocation11 + $0x58] sm:$0xff] %v1749_v4  ;;  %vm1678_vm10 = vmor %vm1676_vm9, %vm1677_vm8 }
 0x679   :  { %v1669_v42 = vsel %vm1668_vm7, %v2172_v58, %v1665_v45  ;;  %v1672_v11 = vmul.f32 %v2174_v37, %v1671_v46 }
 0x67a   :  { %v1712_v1 = vmul.f32 %v1669_v42, %v3088_v14 }
 0x67b   :  { %v1673_v19 = vmul.f32 0.5, %v1672_v11 }
 0x67c   :  { %v1731_v5 = vmul.f32 %v3113_v8, %v1712_v1 }
 0x67d   :  { %v1674_v24 = vsub.f32 1.5, %v1673_v19 }
 0x67e   :  { %v1750_v52 = vadd.f32 %v3120_v6, %v1731_v5 }
 0x67f   :  { %v1675_v15 = vmul.f32 %v2174_v37, %v1674_v24 }
 0x680   :  { %1766 = vst [vmem:[#allocation11 + $0x60] sm:$0xff] %v1750_v52 }
 0x681   :  { %v1679_v25 = vsel %vm1678_vm10, %v2174_v37, %v1675_v15 }
 0x682   :  { %v1713_v31 = vmul.f32 %v1679_v25, %v3094_v60 }
 0x684   :  { %v1732_v28 = vmul.f32 %v3113_v8, %v1713_v31 }
 0x685   :  { %v1505_v29 = vpop.xlane.xlu1 %1504 }
 0x686   :  { %v1751_v0 = vadd.f32 %v3120_v6, %v1732_v28  ;;  %v1522_v14 = vmul.f32 %v1505_v29, %v2635_v59 }
 0x688   :  { %1767 = vst [vmem:[#allocation11 + $0x68] sm:$0xff] %v1751_v0  ;;  %v1538_v32 = vadd.f32 1e-05, %v1522_v14 }
 0x68a   :  { %2175 = vrsqrt.f32 %v1538_v32  ;;  %vm1686_vm12 = vweird.f32 %v1538_v32 }
 0x68d   :  { %v1507_v40 = vpop.xlane.xlu2 %1506 }
 0x68e   :  { %v1523_v50 = vmul.f32 %v1507_v40, %v2635_v59 }
 0x690   :  { %v2176_v20 = vpop.eup %2175  ;;  %v1539_v56 = vadd.f32 1e-05, %v1523_v50 }
 0x691   :  { %v1681_v43 = vmul.f32 %v2176_v20, %v1538_v32  ;;  %vm1687_vm11 = vweird.f32 %v2176_v20 }
 0x692   :  { %2177 = vrsqrt.f32 %v1539_v56  ;;  %vm1688_vm13 = vmor %vm1686_vm12, %vm1687_vm11  ;;  %vm1696_vm15 = vweird.f32 %v1539_v56 }
 0x693   :  { %v1682_v61 = vmul.f32 %v2176_v20, %v1681_v43 }
 0x695   :  { %v1683_v9 = vmul.f32 0.5, %v1682_v61 }
 0x697   :  { %v1684_v60 = vsub.f32 1.5, %v1683_v9 }
 0x698   :  { %v2178_v3 = vpop.eup %2177 }
 0x699   :  { %v1685_v57 = vmul.f32 %v2176_v20, %v1684_v60  ;;  %v1691_v16 = vmul.f32 %v2178_v3, %v1539_v56  ;;  %vm1697_vm14 = vweird.f32 %v2178_v3 }
 0x69a   :  { %vm1698_vm0 = vmor %vm1696_vm15, %vm1697_vm14 }
 0x69b   :  { %v1689_v26 = vsel %vm1688_vm13, %v2176_v20, %v1685_v57  ;;  %v1692_v34 = vmul.f32 %v2178_v3, %v1691_v16 }
 0x69c   :  { %v1714_v54 = vmul.f32 %v1689_v26, %v3101_v35 }
 0x69d   :  { %v1693_v33 = vmul.f32 0.5, %v1692_v34 }
 0x69e   :  { %v1733_v59 = vmul.f32 %v3113_v8, %v1714_v54 }
 0x69f   :  { %v1694_v18 = vsub.f32 1.5, %v1693_v33 }
 0x6a0   :  { %v1752_v12 = vadd.f32 %v3120_v6, %v1733_v59 }
 0x6a1   :  { %v1695_v51 = vmul.f32 %v2178_v3, %v1694_v18 }
 0x6a2   :  { %1768 = vst [vmem:[#allocation11 + $0x70] sm:$0xff] %v1752_v12 }
 0x6a3   :  { %v1699_v38 = vsel %vm1698_vm0, %v2178_v3, %v1695_v51 }
 0x6a4   :  { %v1715_v48 = vmul.f32 %v1699_v38, %v3108_v30 }
 0x6a6   :  { %v1734_v35 = vmul.f32 %v3113_v8, %v1715_v48 }
 0x6a8   :  { %v1753_v41 = vadd.f32 %v3120_v6, %v1734_v35 }
 0x6aa   :  { %1769 = vst [vmem:[#allocation11 + $0x78] sm:$0xff] %v1753_v41 }
 0x6ab   :  { %1782 = dma.vmem_to_hbm [thread:$0]  %s1775_s13, 2048, %s1777_s16, [#allocation4], %s2359_s25, %s2359_s25, %s2360_s26  }
 0x6ac   :  { %2354 = dma.done.wait [#allocation4], 2048  }
 0x6ad   :  { %2355 = vsyncadd [#allocation4], 4294965248 }
 0x6ae   :  { %2356 = dma.done.wait [#allocation13], 1024  }
 0x6af   :  { %2357 = vsyncadd [#allocation13], 4294966272 }
 0x6b0   :  { %1804 = vsyncpa [#allocation3], 1 }
 0x6b1   :  { %1805 = vsyncpa [#allocation6], 1 }
 0x6b2   :  { %1806 = vsyncpa [#allocation9], 1 }
 0x6b3   :  { %1807 = vsyncpa [#allocation4], 1 }
 0x6b4   :  { %1808 = vsyncpa [#allocation13], 1 }

</bundles_post_ra>
